<compile_context>
chip_gen: v5e
topology: v5e:2x2
jax: 0.10.0
libtpu: 0.0.40
codegen_flags: <defaults>
</compile_context>

<pallas_src>
import functools

import jax
import jax.numpy as jnp
from jax import lax
from jax.experimental import pallas as pl
from jax.experimental.pallas import tpu as pltpu


def _round_up(x, m):
    return ((x + m - 1) // m) * m


def _apply_act(h, act_fn):
    if act_fn == "relu":
        return jnp.maximum(h, 0.0)
    if act_fn == "gelu":
        return jax.nn.gelu(h)
    if act_fn == "tanh":
        return jnp.tanh(h)
    if act_fn == "sigmoid":
        return jax.nn.sigmoid(h)
    raise ValueError(f"unsupported act_fn: {act_fn}")


# ----------------------------------------------------------------------------
# Fused kernel: one-hot embedding gather (MXU) -> hidden stack -> Linear(d_model, 1)
# ----------------------------------------------------------------------------
def _fused_kernel(x_cate_ref, x_cont_ref, *refs, n_layers, act_fn, cate_offsets,
                  sum_n_pad):
    # refs = (E, W1_emb, W1_cont, W2..Wn, b_all, w_out, b_out, out_ref)
    *param_refs, out_ref = refs
    assert len(param_refs) == n_layers + 5
    emb_tbl_ref, w1e_ref, w1c_ref = param_refs[0], param_refs[1], param_refs[2]
    w_hidden_refs = param_refs[3:3 + n_layers - 1]
    b_all_ref = param_refs[3 + n_layers - 1]          # f32 (n_layers, d_model_pad)
    w_out_ref = param_refs[3 + n_layers]               # bf16 (1, d_model_pad)
    b_out_ref = param_refs[3 + n_layers + 1]           # f32 (1, 1)

    tile_b = x_cate_ref.shape[0]

    # ---- fused embedding gather: one-hot (TILE_B, sum_n_pad) @ block-diag table ----
    cate = x_cate_ref[...]                                           # (tile_b, n_cols) i32
    col = lax.broadcasted_iota(jnp.int32, (tile_b, sum_n_pad), 1)
    onehot = jnp.zeros((tile_b, sum_n_pad), jnp.float32)
    for j, off in enumerate(cate_offsets):                           # n_cols is tiny; unrolled
        tgt = cate[:, j:j + 1] + off                                 # (tile_b, 1)
        onehot = onehot + (col == tgt).astype(jnp.float32)
    emb = jnp.dot(onehot.astype(jnp.bfloat16), emb_tbl_ref[...],
                  preferred_element_type=jnp.float32)                # == concat of gathers

    # ---- first hidden layer: concat-then-Linear == split-K sum ---------------------
    h = jnp.dot(emb.astype(jnp.bfloat16), w1e_ref[...],
                preferred_element_type=jnp.float32)
    h = h + jnp.dot(x_cont_ref[...].astype(jnp.bfloat16), w1c_ref[...],
                    preferred_element_type=jnp.float32)
    h = _apply_act(h + b_all_ref[0:1, :], act_fn)                    # dropout == identity
    h_low = h.astype(jnp.bfloat16)

    # ---- remaining hidden layers ----------------------------------------------------
    for i in range(1, n_layers):
        h = jnp.dot(h_low, w_hidden_refs[i - 1][...],
                    preferred_element_type=jnp.float32) + b_all_ref[i:i + 1, :]
        h = _apply_act(h, act_fn)
        h_low = h.astype(jnp.bfloat16)

    # ---- output Linear(d_model, 1), lane-dense (1, tile_b) result -------------------
    y = lax.dot_general(w_out_ref[...], h_low,
                        dimension_numbers=(((1,), (1,)), ((), ())),
                        preferred_element_type=jnp.float32)          # (1, tile_b)
    out_ref[...] = (y + b_out_ref[...]).astype(out_ref.dtype)


# ----------------------------------------------------------------------------
# Tile selection from a VMEM budget (generation-safe: v7x has 64 MiB / TensorCore)
# ----------------------------------------------------------------------------
_VMEM_BUDGET_BYTES = 40 * 1024 * 1024
_VMEM_LIMIT_BYTES = 48 * 1024 * 1024


def _pick_tile_b(B, d_model_pad, sum_n_pad, d_emb_tot_pad, param_bytes, cap=4096):
    per_row = (2 * 128 * 4            # x_cont block (f32, lane-padded, double-buffered)
               + 2 * 128 * 4          # x_cate block (i32, lane-padded, double-buffered)
               + 8 * sum_n_pad        # one-hot (f32 + bf16)
               + 8 * d_emb_tot_pad    # gathered embeddings (f32 + bf16)
               + 24 * d_model_pad     # activations f32/bf16 + compiler temporaries
               + 256)                 # output block / misc narrow temps
    avail = int(0.75 * _VMEM_BUDGET_BYTES) - param_bytes
    t = max(avail // per_row, 128)
    t = min(t, cap)
    t = min(t, max(128, _round_up(B, 128)))        # don't over-pad tiny batches
    if B >= 256:
        t = min(t, _round_up((B + 1) // 2, 128))   # >=2 grid steps -> both v7x TCs busy
    return max(128, (t // 128) * 128)


# ----------------------------------------------------------------------------
# Wrapper around pallas_call
# ----------------------------------------------------------------------------
def entity_densenet_forward(x_cont, x_cate, params, *, act_fn, cate_offsets,
                            sum_n_pad, d_model_pad, d_emb_tot_pad, n_layers,
                            tile_b=None):
    B = x_cont.shape[0]
    n_cols = x_cate.shape[1]
    n_cont = x_cont.shape[1]

    # Conservative (8,128)-padded, worst-case-double-buffered parameter footprint.
    param_bytes = 0
    for p in params:
        param_bytes += 2 * _round_up(p.shape[0], 8) * _round_up(p.shape[1], 128) * p.dtype.itemsize

    if tile_b is None:
        tile_b = _pick_tile_b(B, d_model_pad, sum_n_pad, d_emb_tot_pad, param_bytes)
    tile_b = max(128, _round_up(tile_b, 128))
    b_pad = _round_up(max(B, 1), tile_b)
    if b_pad != B:                                   # ragged tail -> zero-pad, slice later
        x_cont = jnp.pad(x_cont, ((0, b_pad - B), (0, 0)))
        x_cate = jnp.pad(x_cate, ((0, b_pad - B), (0, 0)))

    kernel = functools.partial(_fused_kernel, n_layers=n_layers, act_fn=act_fn,
                               cate_offsets=tuple(cate_offsets), sum_n_pad=sum_n_pad)

    flops = int(2 * b_pad * (sum_n_pad * d_emb_tot_pad
                             + d_emb_tot_pad * d_model_pad
                             + n_cont * d_model_pad
                             + (n_layers - 1) * d_model_pad * d_model_pad
                             + d_model_pad))
    transcendentals = 0 if act_fn == "relu" else int(b_pad * d_model_pad * n_layers)
    bytes_accessed = int(x_cont.size * 4 + x_cate.size * 4 + b_pad * 4
                         + sum(int(p.size) * p.dtype.itemsize for p in params))
    cost = pl.CostEstimate(flops=flops, transcendentals=transcendentals,
                           bytes_accessed=bytes_accessed)

    def run(param_pipeline_mode):
        # Per-row inputs tiled over the batch grid (auto double-buffered / pipelined);
        # parameters use constant index maps so they stay VMEM-resident across steps.
        in_specs = [
            pl.BlockSpec((tile_b, n_cols), lambda i: (i, 0)),   # x_cate (int32)
            pl.BlockSpec((tile_b, n_cont), lambda i: (i, 0)),   # x_cont (f32)
        ]
        in_specs += [pl.BlockSpec(p.shape, lambda i: (0, 0),
                                  pipeline_mode=param_pipeline_mode)
                     for p in params]
        return pl.pallas_call(
            kernel,
            out_shape=jax.ShapeDtypeStruct((1, b_pad), jnp.float32),
            grid_spec=pltpu.PrefetchScalarGridSpec(
                num_scalar_prefetch=0,
                grid=(b_pad // tile_b,),
                in_specs=in_specs,
                out_specs=pl.BlockSpec((1, tile_b), lambda i: (0, i)),  # lane-dense store
            ),
            compiler_params=pltpu.CompilerParams(
                dimension_semantics=("parallel",),   # batch tiles shard across TCs (v7x)
                vmem_limit_bytes=_VMEM_LIMIT_BYTES,  # <= 48 MiB: safe on v7x's 64 MiB VMEM
            ),
            cost_estimate=cost,
        )(x_cate, x_cont, *params)

    try:
        y = run(pl.Buffered(1))       # params never change block -> single buffer
    except Exception:                 # fallback if Buffered(1) is rejected by this jax/Mosaic
        y = run(None)
    return y[0, :B]


# ----------------------------------------------------------------------------
# EntityDenseNet in JAX (params + glue) calling the fused Pallas kernel
# ----------------------------------------------------------------------------
class EntityDenseNetPallas:
    def __init__(self, n_cont, n_cates, d_embed, d_model, n_layers, p_drop, act_fn, key):
        assert n_layers >= 1
        self.n_cont = n_cont
        self.n_cates = list(n_cates)
        self.d_embed = d_embed
        self.d_model = d_model
        self.n_layers = n_layers
        self.act_fn = act_fn
        self.p_drop = p_drop  # eval mode: dropout == identity

        n_cols = len(self.n_cates)
        d_emb_tot = n_cols * d_embed
        d_in = n_cont + d_emb_tot
        self.d_model_pad = _round_up(d_model, 128)
        self.d_emb_tot_pad = max(128, _round_up(d_emb_tot, 128))
        self.sum_n = sum(self.n_cates)
        self.sum_n_pad = max(128, _round_up(self.sum_n, 128))

        keys = jax.random.split(key, n_cols + 2 * (n_layers + 1))
        k_iter = iter(keys)

        # Embedding tables (master f32).
        self.embed_tables = [
            0.1 * jax.random.normal(next(k_iter), (n, d_embed), dtype=jnp.float32)
            for n in self.n_cates
        ]

        # Hidden linear layers: weight (in, out), bias (out,).  Master params in f32.
        # (Init scheme differs from torch.nn.Linear's uniform init; irrelevant to kernel.)
        self.hidden_w, self.hidden_b = [], []
        prev = d_in
        for _ in range(n_layers):
            scale = 1.0 / jnp.sqrt(jnp.float32(prev))
            self.hidden_w.append(
                scale * jax.random.normal(next(k_iter), (prev, d_model), dtype=jnp.float32))
            self.hidden_b.append(
                scale * jax.random.normal(next(k_iter), (d_model,), dtype=jnp.float32))
            prev = d_model

        # Output layer Linear(d_model, 1): weight stored as (out=1, in=d_model) row.
        scale = 1.0 / jnp.sqrt(jnp.float32(prev))
        self.out_w = scale * jax.random.normal(next(k_iter), (1, prev), dtype=jnp.float32)
        self.out_b = scale * jax.random.normal(next(k_iter), (1, 1), dtype=jnp.float32)

        # ---- fused / zero-padded kernel parameters --------------------------------
        # Block-diagonal embedding matrix: table j occupies rows [off_j, off_j + n_j)
        # and columns [j*d_embed, (j+1)*d_embed) -> one one-hot matmul yields the
        # concatenated embeddings.
        offs, off = [], 0
        E = jnp.zeros((self.sum_n_pad, self.d_emb_tot_pad), jnp.float32)
        for j, tbl in enumerate(self.embed_tables):
            E = E.at[off:off + tbl.shape[0], j * d_embed:(j + 1) * d_embed].set(tbl)
            offs.append(off)
            off += tbl.shape[0]
        self.cate_offsets = tuple(offs)

        w1 = self.hidden_w[0]
        w1_emb = jnp.zeros((self.d_emb_tot_pad, self.d_model_pad), jnp.float32)
        w1_emb = w1_emb.at[:d_emb_tot, :d_model].set(w1[:d_emb_tot, :])
        w1_cont = jnp.zeros((n_cont, self.d_model_pad), jnp.float32)
        w1_cont = w1_cont.at[:, :d_model].set(w1[d_emb_tot:, :])

        hidden_pad = []
        for w in self.hidden_w[1:]:
            wp = jnp.zeros((self.d_model_pad, self.d_model_pad), jnp.float32)
            hidden_pad.append(wp.at[:d_model, :d_model].set(w))

        b_all = jnp.zeros((n_layers, self.d_model_pad), jnp.float32)
        for i, b in enumerate(self.hidden_b):
            b_all = b_all.at[i, :d_model].set(b)

        w_out_pad = jnp.zeros((1, self.d_model_pad), jnp.float32)
        w_out_pad = w_out_pad.at[:, :d_model].set(self.out_w)

        self.params = ([E.astype(jnp.bfloat16),
                        w1_emb.astype(jnp.bfloat16),
                        w1_cont.astype(jnp.bfloat16)]
                       + [w.astype(jnp.bfloat16) for w in hidden_pad]
                       + [b_all, w_out_pad.astype(jnp.bfloat16), self.out_b])

    def forward(self, x_cont, x_cate, tile_b=None):
        return entity_densenet_forward(
            x_cont.astype(jnp.float32), x_cate.astype(jnp.int32), self.params,
            act_fn=self.act_fn, cate_offsets=self.cate_offsets,
            sum_n_pad=self.sum_n_pad, d_model_pad=self.d_model_pad,
            d_emb_tot_pad=self.d_emb_tot_pad, n_layers=self.n_layers,
            tile_b=tile_b)                                       # (B,)  == x.squeeze(1)

    # -------- pure-JAX references --------------------------------------------------
    def _embed_concat(self, x_cont, x_cate):
        embeds = [jnp.take(tbl, x_cate[:, j], axis=0)
                  for j, tbl in enumerate(self.embed_tables)]
        return jnp.concatenate(embeds + [x_cont.astype(jnp.float32)], axis=1)

    def forward_ref(self, x_cont, x_cate):
        # Same bf16-operand / f32-accumulate numerics as the kernel.
        h_low = self._embed_concat(x_cont, x_cate).astype(jnp.bfloat16)
        for w, b in zip(self.hidden_w, self.hidden_b):
            h = jnp.dot(h_low, w.astype(jnp.bfloat16),
                        preferred_element_type=jnp.float32) + b
            h = _apply_act(h, self.act_fn)
            h_low = h.astype(jnp.bfloat16)
        y = jnp.dot(h_low, self.out_w.astype(jnp.bfloat16).T,
                    preferred_element_type=jnp.float32) + self.out_b
        return y[:, 0]

    def forward_ref_f32(self, x_cont, x_cate):
        # Pure f32 (PyTorch-equivalent math) for a loose sanity check.
        h = self._embed_concat(x_cont, x_cate)
        for w, b in zip(self.hidden_w, self.hidden_b):
            h = _apply_act(h @ w + b, self.act_fn)
        y = h @ self.out_w.T + self.out_b
        return y[:, 0]


# ----------------------------------------------------------------------------
if __name__ == "__main__":
    key = jax.random.PRNGKey(0)
    k_model, k_cont, k_cate = jax.random.split(key, 3)

    # Small shapes consistent with the module signature
    batch = 8
    n_cont = 4
    n_cates = [5, 7, 3]
    d_embed = 8
    d_model = 32
    n_layers = 2
    p_drop = 0.1
    act_fn = "relu"

    model = EntityDenseNetPallas(n_cont, n_cates, d_embed, d_model,
                                 n_layers, p_drop, act_fn, k_model)

    x_cont = jax.random.normal(k_cont, (batch, n_cont), dtype=jnp.float32)
    x_cate = jnp.stack(
        [jax.random.randint(jax.random.fold_in(k_cate, i), (batch,), 0, n)
         for i, n in enumerate(n_cates)], axis=1).astype(jnp.int32)

    out = jax.block_until_ready(model.forward(x_cont, x_cate))
    assert out.shape == (batch,), out.shape

    ref = model.forward_ref(x_cont, x_cate)
    ref_f32 = model.forward_ref_f32(x_cont, x_cate)
    assert jnp.allclose(out, ref, atol=1e-4, rtol=1e-4), (out, ref)
    assert jnp.allclose(out, ref_f32, atol=2e-1, rtol=2e-1), (out, ref_f32)  # bf16 operand tol

    # Second case: multi-step grid (>=2 steps, v7x megacore) + ragged last tile.
    batch2 = 300
    x_cont2 = jax.random.normal(jax.random.fold_in(k_cont, 1), (batch2, n_cont),
                                dtype=jnp.float32)
    x_cate2 = jnp.stack(
        [jax.random.randint(jax.random.fold_in(k_cate, 100 + i), (batch2,), 0, n)
         for i, n in enumerate(n_cates)], axis=1).astype(jnp.int32)

    out2 = jax.block_until_ready(model.forward(x_cont2, x_cate2))   # auto tile -> grid = 2
    ref2 = model.forward_ref(x_cont2, x_cate2)
    assert out2.shape == (batch2,), out2.shape
    assert jnp.allclose(out2, ref2, atol=1e-4, rtol=1e-4), (out2, ref2)

    # Third case: explicit small tile to exercise a 3-step grid.
    out3 = jax.block_until_ready(model.forward(x_cont2, x_cate2, tile_b=128))
    assert jnp.allclose(out3, ref2, atol=1e-4, rtol=1e-4), (out3, ref2)

    print("KERNEL_OK")
</pallas_src>

<mosaic_0001>
module attributes {stable_mosaic.version = 11 : i64} {
  func.func @_fused_kernel(%arg0: i32, %arg1: memref<128x3xi32, #tpu.memory_space<vmem>>, %arg2: memref<128x4xf32, #tpu.memory_space<vmem>>, %arg3: memref<128x128xbf16, #tpu.memory_space<vmem>>, %arg4: memref<128x128xbf16, #tpu.memory_space<vmem>>, %arg5: memref<4x128xbf16, #tpu.memory_space<vmem>>, %arg6: memref<128x128xbf16, #tpu.memory_space<vmem>>, %arg7: memref<2x128xf32, #tpu.memory_space<vmem>>, %arg8: memref<1x128xbf16, #tpu.memory_space<vmem>>, %arg9: memref<1x1xf32, #tpu.memory_space<vmem>>, %arg10: memref<1x128xf32, #tpu.memory_space<vmem>>) attributes {dimension_semantics = [#tpu.dimension_semantics<parallel>], iteration_bounds = array<i64: 1>, scalar_prefetch = 0 : i64, scratch_operands = 0 : i64, tpu.core_type = #tpu.core_type<tc>, window_params = [{transform_indices = @transform_0, window_bounds = array<i64: 128, 3>}, {transform_indices = @transform_1, window_bounds = array<i64: 128, 4>}, {pipeline_mode = #tpu.pipeline_mode<synchronous>, transform_indices = @transform_2, window_bounds = array<i64: 128, 128>}, {pipeline_mode = #tpu.pipeline_mode<synchronous>, transform_indices = @transform_3, window_bounds = array<i64: 128, 128>}, {pipeline_mode = #tpu.pipeline_mode<synchronous>, transform_indices = @transform_4, window_bounds = array<i64: 4, 128>}, {pipeline_mode = #tpu.pipeline_mode<synchronous>, transform_indices = @transform_5, window_bounds = array<i64: 128, 128>}, {pipeline_mode = #tpu.pipeline_mode<synchronous>, transform_indices = @transform_6, window_bounds = array<i64: 2, 128>}, {pipeline_mode = #tpu.pipeline_mode<synchronous>, transform_indices = @transform_7, window_bounds = array<i64: 1, 128>}, {pipeline_mode = #tpu.pipeline_mode<synchronous>, transform_indices = @transform_8, window_bounds = array<i64: 1, 1>}, {transform_indices = @transform_9, window_bounds = array<i64: 1, 128>}]} {
    %c0 = arith.constant 0 : index
    %c0_0 = arith.constant 0 : index
    %0 = vector.load %arg1[%c0, %c0_0] : memref<128x3xi32, #tpu.memory_space<vmem>>, vector<128x3xi32>
    %1 = tpu.iota {dimensions = array<i32: 1>} : vector<128x128xi32>
    %cst = arith.constant 0.000000e+00 : f32
    %2 = vector.broadcast %cst : f32 to vector<128x128xf32>
    %3 = vector.extract_strided_slice %0 {offsets = [0, 0], sizes = [128, 1], strides = [1, 1]} : vector<128x3xi32> to vector<128x1xi32>
    %c0_i32 = arith.constant 0 : i32
    %4 = vector.broadcast %c0_i32 : i32 to vector<128x1xi32>
    %5 = arith.addi %3, %4 : vector<128x1xi32>
    %6 = vector.broadcast %5 : vector<128x1xi32> to vector<128x128xi32>
    %7 = arith.cmpi eq, %1, %6 : vector<128x128xi32>
    %8 = arith.extui %7 : vector<128x128xi1> to vector<128x128xi32>
    %9 = arith.sitofp %8 : vector<128x128xi32> to vector<128x128xf32>
    %10 = arith.addf %2, %9 : vector<128x128xf32>
    %11 = vector.extract_strided_slice %0 {offsets = [0, 1], sizes = [128, 1], strides = [1, 1]} : vector<128x3xi32> to vector<128x1xi32>
    %c5_i32 = arith.constant 5 : i32
    %12 = vector.broadcast %c5_i32 : i32 to vector<128x1xi32>
    %13 = arith.addi %11, %12 : vector<128x1xi32>
    %14 = vector.broadcast %13 : vector<128x1xi32> to vector<128x128xi32>
    %15 = arith.cmpi eq, %1, %14 : vector<128x128xi32>
    %16 = arith.extui %15 : vector<128x128xi1> to vector<128x128xi32>
    %17 = arith.sitofp %16 : vector<128x128xi32> to vector<128x128xf32>
    %18 = arith.addf %10, %17 : vector<128x128xf32>
    %19 = vector.extract_strided_slice %0 {offsets = [0, 2], sizes = [128, 1], strides = [1, 1]} : vector<128x3xi32> to vector<128x1xi32>
    %c12_i32 = arith.constant 12 : i32
    %20 = vector.broadcast %c12_i32 : i32 to vector<128x1xi32>
    %21 = arith.addi %19, %20 : vector<128x1xi32>
    %22 = vector.broadcast %21 : vector<128x1xi32> to vector<128x128xi32>
    %23 = arith.cmpi eq, %1, %22 : vector<128x128xi32>
    %24 = arith.extui %23 : vector<128x128xi1> to vector<128x128xi32>
    %25 = arith.sitofp %24 : vector<128x128xi32> to vector<128x128xf32>
    %26 = arith.addf %18, %25 : vector<128x128xf32>
    %27 = arith.truncf %26 : vector<128x128xf32> to vector<128x128xbf16>
    %c0_1 = arith.constant 0 : index
    %c0_2 = arith.constant 0 : index
    %28 = vector.load %arg3[%c0_1, %c0_2] : memref<128x128xbf16, #tpu.memory_space<vmem>>, vector<128x128xbf16>
    %cst_3 = arith.constant dense<0.000000e+00> : vector<128x128xf32>
    %29 = tpu.matmul %27, %28, %cst_3 {dimension_numbers = #tpu.dot_dimension_numbers<[1], [0], [0], [1], [0, 0, 1, 1], [], []>} : vector<128x128xbf16>, vector<128x128xbf16>, vector<128x128xf32> -> vector<128x128xf32>
    %30 = arith.truncf %29 : vector<128x128xf32> to vector<128x128xbf16>
    %c0_4 = arith.constant 0 : index
    %c0_5 = arith.constant 0 : index
    %31 = vector.load %arg4[%c0_4, %c0_5] : memref<128x128xbf16, #tpu.memory_space<vmem>>, vector<128x128xbf16>
    %cst_6 = arith.constant dense<0.000000e+00> : vector<128x128xf32>
    %32 = tpu.matmul %30, %31, %cst_6 {dimension_numbers = #tpu.dot_dimension_numbers<[1], [0], [0], [1], [0, 0, 1, 1], [], []>} : vector<128x128xbf16>, vector<128x128xbf16>, vector<128x128xf32> -> vector<128x128xf32>
    %c0_7 = arith.constant 0 : index
    %c0_8 = arith.constant 0 : index
    %33 = vector.load %arg2[%c0_7, %c0_8] : memref<128x4xf32, #tpu.memory_space<vmem>>, vector<128x4xf32>
    %34 = arith.truncf %33 : vector<128x4xf32> to vector<128x4xbf16>
    %c0_9 = arith.constant 0 : index
    %c0_10 = arith.constant 0 : index
    %35 = vector.load %arg5[%c0_9, %c0_10] : memref<4x128xbf16, #tpu.memory_space<vmem>>, vector<4x128xbf16>
    %cst_11 = arith.constant dense<0.000000e+00> : vector<128x128xf32>
    %36 = tpu.matmul %34, %35, %cst_11 {dimension_numbers = #tpu.dot_dimension_numbers<[1], [0], [0], [1], [0, 0, 1, 1], [], []>} : vector<128x4xbf16>, vector<4x128xbf16>, vector<128x128xf32> -> vector<128x128xf32>
    %37 = arith.addf %32, %36 : vector<128x128xf32>
    %c0_12 = arith.constant 0 : index
    %c0_13 = arith.constant 0 : index
    %38 = vector.load %arg7[%c0_12, %c0_13] : memref<2x128xf32, #tpu.memory_space<vmem>>, vector<1x128xf32>
    %39 = vector.broadcast %38 : vector<1x128xf32> to vector<128x128xf32>
    %40 = arith.addf %37, %39 : vector<128x128xf32>
    %cst_14 = arith.constant 0.000000e+00 : f32
    %41 = vector.broadcast %cst_14 : f32 to vector<128x128xf32>
    %42 = arith.maximumf %40, %41 : vector<128x128xf32>
    %43 = arith.truncf %42 : vector<128x128xf32> to vector<128x128xbf16>
    %c0_15 = arith.constant 0 : index
    %c0_16 = arith.constant 0 : index
    %44 = vector.load %arg6[%c0_15, %c0_16] : memref<128x128xbf16, #tpu.memory_space<vmem>>, vector<128x128xbf16>
    %cst_17 = arith.constant dense<0.000000e+00> : vector<128x128xf32>
    %45 = tpu.matmul %43, %44, %cst_17 {dimension_numbers = #tpu.dot_dimension_numbers<[1], [0], [0], [1], [0, 0, 1, 1], [], []>} : vector<128x128xbf16>, vector<128x128xbf16>, vector<128x128xf32> -> vector<128x128xf32>
    %c1 = arith.constant 1 : index
    %c0_18 = arith.constant 0 : index
    %46 = vector.load %arg7[%c1, %c0_18] : memref<2x128xf32, #tpu.memory_space<vmem>>, vector<1x128xf32>
    %47 = vector.broadcast %46 : vector<1x128xf32> to vector<128x128xf32>
    %48 = arith.addf %45, %47 : vector<128x128xf32>
    %cst_19 = arith.constant 0.000000e+00 : f32
    %49 = vector.broadcast %cst_19 : f32 to vector<128x128xf32>
    %50 = arith.maximumf %48, %49 : vector<128x128xf32>
    %51 = arith.truncf %50 : vector<128x128xf32> to vector<128x128xbf16>
    %c0_20 = arith.constant 0 : index
    %c0_21 = arith.constant 0 : index
    %52 = vector.load %arg8[%c0_20, %c0_21] : memref<1x128xbf16, #tpu.memory_space<vmem>>, vector<1x128xbf16>
    %cst_22 = arith.constant dense<0.000000e+00> : vector<1x128xf32>
    %53 = tpu.matmul %52, %51, %cst_22 {dimension_numbers = #tpu.dot_dimension_numbers<[1], [1], [0], [0], [0, 0, 1, 0], [], []>} : vector<1x128xbf16>, vector<128x128xbf16>, vector<1x128xf32> -> vector<1x128xf32>
    %c0_23 = arith.constant 0 : index
    %c0_24 = arith.constant 0 : index
    %54 = vector.load %arg9[%c0_23, %c0_24] : memref<1x1xf32, #tpu.memory_space<vmem>>, vector<1x1xf32>
    %55 = vector.broadcast %54 : vector<1x1xf32> to vector<1x128xf32>
    %56 = arith.addf %53, %55 : vector<1x128xf32>
    %c0_25 = arith.constant 0 : index
    %c0_26 = arith.constant 0 : index
    %57 = vector.load %arg10[%c0_25, %c0_26] : memref<1x128xf32, #tpu.memory_space<vmem>>, vector<1x128xf32>
    tpu.vector_store %arg10[%c0_25, %c0_26], %56 {strides = array<i32>} : memref<1x128xf32, #tpu.memory_space<vmem>>, vector<1x128xf32>,
    return
  }
  func.func @transform_0(%arg0: i32) -> (i32, i32) {
    %c0_i32 = arith.constant 0 : i32
    %c0_i32_0 = arith.constant 0 : i32
    return %arg0, %c0_i32 : i32, i32
  }
  func.func @transform_1(%arg0: i32) -> (i32, i32) {
    %c0_i32 = arith.constant 0 : i32
    %c0_i32_0 = arith.constant 0 : i32
    return %arg0, %c0_i32 : i32, i32
  }
  func.func @transform_2(%arg0: i32) -> (i32, i32) {
    %c0_i32 = arith.constant 0 : i32
    %c0_i32_0 = arith.constant 0 : i32
    %c0_i32_1 = arith.constant 0 : i32
    return %c0_i32, %c0_i32_0 : i32, i32
  }
  func.func @transform_3(%arg0: i32) -> (i32, i32) {
    %c0_i32 = arith.constant 0 : i32
    %c0_i32_0 = arith.constant 0 : i32
    %c0_i32_1 = arith.constant 0 : i32
    return %c0_i32, %c0_i32_0 : i32, i32
  }
  func.func @transform_4(%arg0: i32) -> (i32, i32) {
    %c0_i32 = arith.constant 0 : i32
    %c0_i32_0 = arith.constant 0 : i32
    %c0_i32_1 = arith.constant 0 : i32
    return %c0_i32, %c0_i32_0 : i32, i32
  }
  func.func @transform_5(%arg0: i32) -> (i32, i32) {
    %c0_i32 = arith.constant 0 : i32
    %c0_i32_0 = arith.constant 0 : i32
    %c0_i32_1 = arith.constant 0 : i32
    return %c0_i32, %c0_i32_0 : i32, i32
  }
  func.func @transform_6(%arg0: i32) -> (i32, i32) {
    %c0_i32 = arith.constant 0 : i32
    %c0_i32_0 = arith.constant 0 : i32
    %c0_i32_1 = arith.constant 0 : i32
    return %c0_i32, %c0_i32_0 : i32, i32
  }
  func.func @transform_7(%arg0: i32) -> (i32, i32) {
    %c0_i32 = arith.constant 0 : i32
    %c0_i32_0 = arith.constant 0 : i32
    %c0_i32_1 = arith.constant 0 : i32
    return %c0_i32, %c0_i32_0 : i32, i32
  }
  func.func @transform_8(%arg0: i32) -> (i32, i32) {
    %c0_i32 = arith.constant 0 : i32
    %c0_i32_0 = arith.constant 0 : i32
    %c0_i32_1 = arith.constant 0 : i32
    return %c0_i32, %c0_i32_0 : i32, i32
  }
  func.func @transform_9(%arg0: i32) -> (i32, i32) {
    %c0_i32 = arith.constant 0 : i32
    %c0_i32_0 = arith.constant 0 : i32
    return %c0_i32, %arg0 : i32, i32
  }
}

module attributes {stable_mosaic.version = 11 : i64} {
  func.func @_fused_kernel(%arg0: i32, %arg1: memref<128x3xi32, #tpu.memory_space<vmem>>, %arg2: memref<128x4xf32, #tpu.memory_space<vmem>>, %arg3: memref<128x128xbf16, #tpu.memory_space<vmem>>, %arg4: memref<128x128xbf16, #tpu.memory_space<vmem>>, %arg5: memref<4x128xbf16, #tpu.memory_space<vmem>>, %arg6: memref<128x128xbf16, #tpu.memory_space<vmem>>, %arg7: memref<2x128xf32, #tpu.memory_space<vmem>>, %arg8: memref<1x128xbf16, #tpu.memory_space<vmem>>, %arg9: memref<1x1xf32, #tpu.memory_space<vmem>>, %arg10: memref<1x128xf32, #tpu.memory_space<vmem>>) attributes {dimension_semantics = [#tpu.dimension_semantics<parallel>], iteration_bounds = array<i64: 1>, scalar_prefetch = 0 : i64, scratch_operands = 0 : i64, tpu.core_type = #tpu.core_type<tc>, window_params = [{transform_indices = @transform_0, window_bounds = array<i64: 128, 3>}, {transform_indices = @transform_1, window_bounds = array<i64: 128, 4>}, {pipeline_mode = #tpu.pipeline_mode<synchronous>, transform_indices = @transform_2, window_bounds = array<i64: 128, 128>}, {pipeline_mode = #tpu.pipeline_mode<synchronous>, transform_indices = @transform_3, window_bounds = array<i64: 128, 128>}, {pipeline_mode = #tpu.pipeline_mode<synchronous>, transform_indices = @transform_4, window_bounds = array<i64: 4, 128>}, {pipeline_mode = #tpu.pipeline_mode<synchronous>, transform_indices = @transform_5, window_bounds = array<i64: 128, 128>}, {pipeline_mode = #tpu.pipeline_mode<synchronous>, transform_indices = @transform_6, window_bounds = array<i64: 2, 128>}, {pipeline_mode = #tpu.pipeline_mode<synchronous>, transform_indices = @transform_7, window_bounds = array<i64: 1, 128>}, {pipeline_mode = #tpu.pipeline_mode<synchronous>, transform_indices = @transform_8, window_bounds = array<i64: 1, 1>}, {transform_indices = @transform_9, window_bounds = array<i64: 1, 128>}]} {
    %c0 = arith.constant 0 : index
    %c0_0 = arith.constant 0 : index
    %0 = vector.load %arg1[%c0, %c0_0] : memref<128x3xi32, #tpu.memory_space<vmem>>, vector<128x3xi32>
    %1 = tpu.iota {dimensions = array<i32: 1>} : vector<128x128xi32>
    %cst = arith.constant 0.000000e+00 : f32
    %2 = vector.broadcast %cst : f32 to vector<128x128xf32>
    %3 = vector.extract_strided_slice %0 {offsets = [0, 0], sizes = [128, 1], strides = [1, 1]} : vector<128x3xi32> to vector<128x1xi32>
    %c0_i32 = arith.constant 0 : i32
    %4 = vector.broadcast %c0_i32 : i32 to vector<128x1xi32>
    %5 = arith.addi %3, %4 : vector<128x1xi32>
    %6 = vector.broadcast %5 : vector<128x1xi32> to vector<128x128xi32>
    %7 = arith.cmpi eq, %1, %6 : vector<128x128xi32>
    %8 = arith.extui %7 : vector<128x128xi1> to vector<128x128xi32>
    %9 = arith.sitofp %8 : vector<128x128xi32> to vector<128x128xf32>
    %10 = arith.addf %2, %9 : vector<128x128xf32>
    %11 = vector.extract_strided_slice %0 {offsets = [0, 1], sizes = [128, 1], strides = [1, 1]} : vector<128x3xi32> to vector<128x1xi32>
    %c5_i32 = arith.constant 5 : i32
    %12 = vector.broadcast %c5_i32 : i32 to vector<128x1xi32>
    %13 = arith.addi %11, %12 : vector<128x1xi32>
    %14 = vector.broadcast %13 : vector<128x1xi32> to vector<128x128xi32>
    %15 = arith.cmpi eq, %1, %14 : vector<128x128xi32>
    %16 = arith.extui %15 : vector<128x128xi1> to vector<128x128xi32>
    %17 = arith.sitofp %16 : vector<128x128xi32> to vector<128x128xf32>
    %18 = arith.addf %10, %17 : vector<128x128xf32>
    %19 = vector.extract_strided_slice %0 {offsets = [0, 2], sizes = [128, 1], strides = [1, 1]} : vector<128x3xi32> to vector<128x1xi32>
    %c12_i32 = arith.constant 12 : i32
    %20 = vector.broadcast %c12_i32 : i32 to vector<128x1xi32>
    %21 = arith.addi %19, %20 : vector<128x1xi32>
    %22 = vector.broadcast %21 : vector<128x1xi32> to vector<128x128xi32>
    %23 = arith.cmpi eq, %1, %22 : vector<128x128xi32>
    %24 = arith.extui %23 : vector<128x128xi1> to vector<128x128xi32>
    %25 = arith.sitofp %24 : vector<128x128xi32> to vector<128x128xf32>
    %26 = arith.addf %18, %25 : vector<128x128xf32>
    %27 = arith.truncf %26 : vector<128x128xf32> to vector<128x128xbf16>
    %c0_1 = arith.constant 0 : index
    %c0_2 = arith.constant 0 : index
    %28 = vector.load %arg3[%c0_1, %c0_2] : memref<128x128xbf16, #tpu.memory_space<vmem>>, vector<128x128xbf16>
    %cst_3 = arith.constant dense<0.000000e+00> : vector<128x128xf32>
    %29 = tpu.matmul %27, %28, %cst_3 {dimension_numbers = #tpu.dot_dimension_numbers<[1], [0], [0], [1], [0, 0, 1, 1], [], []>} : vector<128x128xbf16>, vector<128x128xbf16>, vector<128x128xf32> -> vector<128x128xf32>
    %30 = arith.truncf %29 : vector<128x128xf32> to vector<128x128xbf16>
    %c0_4 = arith.constant 0 : index
    %c0_5 = arith.constant 0 : index
    %31 = vector.load %arg4[%c0_4, %c0_5] : memref<128x128xbf16, #tpu.memory_space<vmem>>, vector<128x128xbf16>
    %cst_6 = arith.constant dense<0.000000e+00> : vector<128x128xf32>
    %32 = tpu.matmul %30, %31, %cst_6 {dimension_numbers = #tpu.dot_dimension_numbers<[1], [0], [0], [1], [0, 0, 1, 1], [], []>} : vector<128x128xbf16>, vector<128x128xbf16>, vector<128x128xf32> -> vector<128x128xf32>
    %c0_7 = arith.constant 0 : index
    %c0_8 = arith.constant 0 : index
    %33 = vector.load %arg2[%c0_7, %c0_8] : memref<128x4xf32, #tpu.memory_space<vmem>>, vector<128x4xf32>
    %34 = arith.truncf %33 : vector<128x4xf32> to vector<128x4xbf16>
    %c0_9 = arith.constant 0 : index
    %c0_10 = arith.constant 0 : index
    %35 = vector.load %arg5[%c0_9, %c0_10] : memref<4x128xbf16, #tpu.memory_space<vmem>>, vector<4x128xbf16>
    %cst_11 = arith.constant dense<0.000000e+00> : vector<128x128xf32>
    %36 = tpu.matmul %34, %35, %cst_11 {dimension_numbers = #tpu.dot_dimension_numbers<[1], [0], [0], [1], [0, 0, 1, 1], [], []>} : vector<128x4xbf16>, vector<4x128xbf16>, vector<128x128xf32> -> vector<128x128xf32>
    %37 = arith.addf %32, %36 : vector<128x128xf32>
    %c0_12 = arith.constant 0 : index
    %c0_13 = arith.constant 0 : index
    %38 = vector.load %arg7[%c0_12, %c0_13] : memref<2x128xf32, #tpu.memory_space<vmem>>, vector<1x128xf32>
    %39 = vector.broadcast %38 : vector<1x128xf32> to vector<128x128xf32>
    %40 = arith.addf %37, %39 : vector<128x128xf32>
    %cst_14 = arith.constant 0.000000e+00 : f32
    %41 = vector.broadcast %cst_14 : f32 to vector<128x128xf32>
    %42 = arith.maximumf %40, %41 : vector<128x128xf32>
    %43 = arith.truncf %42 : vector<128x128xf32> to vector<128x128xbf16>
    %c0_15 = arith.constant 0 : index
    %c0_16 = arith.constant 0 : index
    %44 = vector.load %arg6[%c0_15, %c0_16] : memref<128x128xbf16, #tpu.memory_space<vmem>>, vector<128x128xbf16>
    %cst_17 = arith.constant dense<0.000000e+00> : vector<128x128xf32>
    %45 = tpu.matmul %43, %44, %cst_17 {dimension_numbers = #tpu.dot_dimension_numbers<[1], [0], [0], [1], [0, 0, 1, 1], [], []>} : vector<128x128xbf16>, vector<128x128xbf16>, vector<128x128xf32> -> vector<128x128xf32>
    %c1 = arith.constant 1 : index
    %c0_18 = arith.constant 0 : index
    %46 = vector.load %arg7[%c1, %c0_18] : memref<2x128xf32, #tpu.memory_space<vmem>>, vector<1x128xf32>
    %47 = vector.broadcast %46 : vector<1x128xf32> to vector<128x128xf32>
    %48 = arith.addf %45, %47 : vector<128x128xf32>
    %cst_19 = arith.constant 0.000000e+00 : f32
    %49 = vector.broadcast %cst_19 : f32 to vector<128x128xf32>
    %50 = arith.maximumf %48, %49 : vector<128x128xf32>
    %51 = arith.truncf %50 : vector<128x128xf32> to vector<128x128xbf16>
    %c0_20 = arith.constant 0 : index
    %c0_21 = arith.constant 0 : index
    %52 = vector.load %arg8[%c0_20, %c0_21] : memref<1x128xbf16, #tpu.memory_space<vmem>>, vector<1x128xbf16>
    %cst_22 = arith.constant dense<0.000000e+00> : vector<1x128xf32>
    %53 = tpu.matmul %52, %51, %cst_22 {dimension_numbers = #tpu.dot_dimension_numbers<[1], [1], [0], [0], [0, 0, 1, 0], [], []>} : vector<1x128xbf16>, vector<128x128xbf16>, vector<1x128xf32> -> vector<1x128xf32>
    %c0_23 = arith.constant 0 : index
    %c0_24 = arith.constant 0 : index
    %54 = vector.load %arg9[%c0_23, %c0_24] : memref<1x1xf32, #tpu.memory_space<vmem>>, vector<1x1xf32>
    %55 = vector.broadcast %54 : vector<1x1xf32> to vector<1x128xf32>
    %56 = arith.addf %53, %55 : vector<1x128xf32>
    %c0_25 = arith.constant 0 : index
    %c0_26 = arith.constant 0 : index
    %57 = vector.load %arg10[%c0_25, %c0_26] : memref<1x128xf32, #tpu.memory_space<vmem>>, vector<1x128xf32>
    tpu.vector_store %arg10[%c0_25, %c0_26], %56 {strides = array<i32>} : memref<1x128xf32, #tpu.memory_space<vmem>>, vector<1x128xf32>,
    return
  }
  func.func @transform_0(%arg0: i32) -> (i32, i32) {
    %c0_i32 = arith.constant 0 : i32
    %c0_i32_0 = arith.constant 0 : i32
    return %arg0, %c0_i32 : i32, i32
  }
  func.func @transform_1(%arg0: i32) -> (i32, i32) {
    %c0_i32 = arith.constant 0 : i32
    %c0_i32_0 = arith.constant 0 : i32
    return %arg0, %c0_i32 : i32, i32
  }
  func.func @transform_2(%arg0: i32) -> (i32, i32) {
    %c0_i32 = arith.constant 0 : i32
    %c0_i32_0 = arith.constant 0 : i32
    %c0_i32_1 = arith.constant 0 : i32
    return %c0_i32, %c0_i32_0 : i32, i32
  }
  func.func @transform_3(%arg0: i32) -> (i32, i32) {
    %c0_i32 = arith.constant 0 : i32
    %c0_i32_0 = arith.constant 0 : i32
    %c0_i32_1 = arith.constant 0 : i32
    return %c0_i32, %c0_i32_0 : i32, i32
  }
  func.func @transform_4(%arg0: i32) -> (i32, i32) {
    %c0_i32 = arith.constant 0 : i32
    %c0_i32_0 = arith.constant 0 : i32
    %c0_i32_1 = arith.constant 0 : i32
    return %c0_i32, %c0_i32_0 : i32, i32
  }
  func.func @transform_5(%arg0: i32) -> (i32, i32) {
    %c0_i32 = arith.constant 0 : i32
    %c0_i32_0 = arith.constant 0 : i32
    %c0_i32_1 = arith.constant 0 : i32
    return %c0_i32, %c0_i32_0 : i32, i32
  }
  func.func @transform_6(%arg0: i32) -> (i32, i32) {
    %c0_i32 = arith.constant 0 : i32
    %c0_i32_0 = arith.constant 0 : i32
    %c0_i32_1 = arith.constant 0 : i32
    return %c0_i32, %c0_i32_0 : i32, i32
  }
  func.func @transform_7(%arg0: i32) -> (i32, i32) {
    %c0_i32 = arith.constant 0 : i32
    %c0_i32_0 = arith.constant 0 : i32
    %c0_i32_1 = arith.constant 0 : i32
    return %c0_i32, %c0_i32_0 : i32, i32
  }
  func.func @transform_8(%arg0: i32) -> (i32, i32) {
    %c0_i32 = arith.constant 0 : i32
    %c0_i32_0 = arith.constant 0 : i32
    %c0_i32_1 = arith.constant 0 : i32
    return %c0_i32, %c0_i32_0 : i32, i32
  }
  func.func @transform_9(%arg0: i32) -> (i32, i32) {
    %c0_i32 = arith.constant 0 : i32
    %c0_i32_0 = arith.constant 0 : i32
    return %c0_i32, %arg0 : i32, i32
  }
}

</mosaic_0001>

<bundles_post_ra>
// kernel: tpu_custom_call.1
= control target key start
LH: loop header
LB: loop body
LE: loop exit
PB: predicated region body
PF: predicated region fallthrough
CT: control target
= control target key end

     0   :  { %s1647_s0 = inlined_call_operand.vmem [shape: s32[128,3], index: 0, kind: input, shape index: {}]   ;;  %s1648_s1 = inlined_call_operand.vmem [shape: f32[128,4], index: 1, kind: input, shape index: {}]   ;;  %s1649_s2 = inlined_call_operand.vmem [shape: bf16[128,128], index: 2, kind: input, shape index: {}]   ;;  %s1650_s3 = inlined_call_operand.vmem [shape: bf16[128,128], index: 3, kind: input, shape index: {}]   ;;  %s1651_s4 = inlined_call_operand.vmem [shape: bf16[4,128], index: 4, kind: input, shape index: {}]   ;;  %s1652_s5 = inlined_call_operand.vmem [shape: bf16[128,128], index: 5, kind: input, shape index: {}]   ;;  %s1653_s6 = inlined_call_operand.vmem [shape: f32[2,128], index: 6, kind: input, shape index: {}]   ;;  %s1654_s7 = inlined_call_operand.vmem [shape: bf16[1,128], index: 7, kind: input, shape index: {}]   ;;  %s1655_s8 = inlined_call_operand.<no memory space> [shape: f32[1,1], index: 8, kind: input, shape index: {}]   ;;  %s1656_s9 = inlined_call_operand.hbm [shape: f32[1,128], index: 9, kind: output, shape index: {}]  }
   0x1   :  { %v14_v0 = vstv %s1655_s8 }
   0x2   :  { %15 = vst [vmem:[#allocation2] sm:$0x1] %v14_v0 }
   0x3   :  { %v36_v1 = vld [vmem:[%s1647_s0] sm:$0xff]  ;;  %v1236_v2 = vmov 0   ;;  %v1237_v3 = vmov 1   ;;  %v1238_v6 = vmov 2  }
   0x4   :  { %1167 = vset.pattern.permute.xlu0 %v1236_v2  ;;  %1168 = vset.pattern.permute.xlu1 %v1237_v3  ;;  %v166_v4 = vadd.s32 5, %v36_v1  ;;  %v294_v5 = vadd.s32 12, %v36_v1 }
   0x5   :  { %55 = vperm.xlu0 %1167, %v36_v1   ;;  %1169 = vset.pattern.permute.xlu2 %v1238_v6 }
   0x6   :  { %183 = vperm.xlu1 %1168, %v166_v4   ;;  %311 = vperm.xlu2 %1169, %v294_v5  }
   0x7   :  { %16 = vsyncpa [#allocation4], 0  ;;  %v37_v7 = vld [vmem:[%s1647_s0 + $0x8] sm:$0xff]  ;;  %v38_v10 = vld [vmem:[%s1647_s0 + $0x10] sm:$0xff]  ;;  %v52_v56 = vlaneseq  ;;  %v1239_v61 = vmov 0.0   ;;  %s1240_s29 = smov [#allocation3]  }
   0x8   :  { %v167_v8 = vadd.s32 5, %v37_v7  ;;  %v295_v9 = vadd.s32 12, %v37_v7  ;;  %v168_v11 = vadd.s32 5, %v38_v10  ;;  %v39_v12 = vld [vmem:[%s1647_s0 + $0x18] sm:$0xff]  ;;  %v296_v14 = vadd.s32 12, %v38_v10  ;;  %v40_v16 = vld [vmem:[%s1647_s0 + $0x20] sm:$0xff] }
   0x9   :  { %v169_v13 = vadd.s32 5, %v39_v12  ;;  %v297_v15 = vadd.s32 12, %v39_v12  ;;  %v170_v17 = vadd.s32 5, %v40_v16  ;;  %v41_v18 = vld [vmem:[%s1647_s0 + $0x28] sm:$0xff]  ;;  %v298_v21 = vadd.s32 12, %v40_v16  ;;  %v42_v22 = vld [vmem:[%s1647_s0 + $0x30] sm:$0xff] }
   0xa   :  { %v299_v19 = vadd.s32 12, %v41_v18  ;;  %v171_v20 = vadd.s32 5, %v41_v18  ;;  %v300_v23 = vadd.s32 12, %v42_v22  ;;  %v43_v24 = vld [vmem:[%s1647_s0 + $0x38] sm:$0xff]  ;;  %v45_v25 = vld [vmem:[%s1647_s0 + $0x48] sm:$0xff]  ;;  %v172_v26 = vadd.s32 5, %v42_v22 }
   0xb   :  { %v173_v27 = vadd.s32 5, %v43_v24  ;;  %v46_v28 = vld [vmem:[%s1647_s0 + $0x50] sm:$0xff]  ;;  %v1145_v29 = vld [vmem:[%s1649_s2 + $0x38] sm:$0xff]  ;;  %v301_v30 = vadd.s32 12, %v43_v24  ;;  %v44_v33 = vld [vmem:[%s1647_s0 + $0x40] sm:$0xff]  ;;  %v175_v37 = vadd.s32 5, %v45_v25 }
   0xc   :  { %v47_v31 = vld [vmem:[%s1647_s0 + $0x58] sm:$0xff]  ;;  %494 = vmatpush.bf16.msra.mxu0 %v1145_v29  ;;  %v1144_v32 = vld [vmem:[%s1649_s2 + $0x30] sm:$0xff]  ;;  %v1143_v35 = vld [vmem:[%s1649_s2 + $0x28] sm:$0xff]  ;;  %v174_v36 = vadd.s32 5, %v44_v33  ;;  %v302_v42 = vadd.s32 12, %v44_v33  ;;  %v303_v43 = vadd.s32 12, %v45_v25 }
   0xd   :  { %58 = vperm.xlu0 %1167, %v37_v7   ;;  %v177_v34 = vadd.s32 5, %v47_v31  ;;  %v1142_v38 = vld [vmem:[%s1649_s2 + $0x20] sm:$0xff]  ;;  %v1141_v40 = vld [vmem:[%s1649_s2 + $0x18] sm:$0xff]  ;;  %v1140_v44 = vld [vmem:[%s1649_s2 + $0x10] sm:$0xff]  ;;  %v176_v48 = vadd.s32 5, %v46_v28  ;;  %v304_v53 = vadd.s32 12, %v46_v28 }
   0xe   :  { %186 = vperm.xlu1 %1168, %v167_v8   ;;  %314 = vperm.xlu2 %1169, %v295_v9   ;;  %v48_v39 = vld [vmem:[%s1647_s0 + $0x60] sm:$0xff]  ;;  %v1139_v45 = vld [vmem:[%s1649_s2 + $0x8] sm:$0xff]  ;;  %v1391_v51 = vld [vmem:[%s1647_s0 + $0x70] sm:$0xff]  ;;  %v305_v54 = vadd.s32 12, %v47_v31  ;;  %v1397_v57 = vand.u32 127, %v52_v56  ;;  %s977_s11 = sshll.u32 %s1656_s9, 4  ;;  %s978_s11 = int_to_ptr.hbm [resolvable:$true] %s977_s11 }
   0xf   :  { %v178_v41 = vadd.s32 5, %v48_v39  ;;  %v49_v46 = vld [vmem:[%s1647_s0 + $0x68] sm:$0xff]  ;;  %v1138_v49 = vld [vmem:[%s1649_s2] sm:$0xff]  ;;  %v308_v52 = vadd.s32 12, %v1391_v51  ;;  %v306_v4 = vadd.s32 12, %v48_v39 }
  0x10   :  { %495 = vmatpush.bf16.msra.mxu0 %v1144_v32  ;;  %v307_v47 = vadd.s32 12, %v49_v46  ;;  %v179_v1 = vadd.s32 5, %v49_v46 }
  0x14   :  { %496 = vmatpush.bf16.msra.mxu0 %v1143_v35 }
  0x15   :  { %61 = vperm.xlu0 %1167, %v38_v10  }
  0x16   :  { %1170 = vset.pattern.permute.xlu1 %v1236_v2  ;;  %1171 = vset.pattern.permute.xlu2 %v1237_v3 }
  0x17   :  { %64 = vperm.xlu1 %1170, %v39_v12   ;;  %189 = vperm.xlu2 %1171, %v168_v11  }
  0x18   :  { %497 = vmatpush.bf16.msra.mxu0 %v1142_v38 }
  0x1c   :  { %498 = vmatpush.bf16.msra.mxu0 %v1141_v40 }
  0x1d   :  { %1172 = vset.pattern.permute.xlu0 %v1237_v3 }
  0x1e   :  { %192 = vperm.xlu0 %1172, %v169_v13  }
  0x1f   :  { %1173 = vset.pattern.permute.xlu1 %v1238_v6  ;;  %1174 = vset.pattern.permute.xlu2 %v1238_v6 }
  0x20   :  { %317 = vperm.xlu1 %1173, %v296_v14   ;;  %320 = vperm.xlu2 %1174, %v297_v15  }
  0x21   :  { %499 = vmatpush.bf16.msra.mxu0 %v1140_v44 }
  0x25   :  { %500 = vmatpush.bf16.msra.mxu0 %v1139_v45 }
  0x26   :  { %195 = vperm.xlu0 %1172, %v170_v17  }
  0x28   :  { %1175 = vset.pattern.permute.xlu1 %v1236_v2  ;;  %1176 = vset.pattern.permute.xlu2 %v1236_v2 }
  0x29   :  { %67 = vperm.xlu1 %1175, %v40_v16   ;;  %70 = vperm.xlu2 %1176, %v41_v18  }
  0x2a   :  { %501 = vmatpush.bf16.msra.mxu0 %v1138_v49 }
  0x2e   :  { %1179 = vset.pattern.permute.xlu0 %v1238_v6 }
  0x2f   :  { %326 = vperm.xlu0 %1179, %v299_v19   ;;  %v51_v19 = vld [vmem:[%s1647_s0 + $0x78] sm:$0xff] }
  0x30   :  { %v309_v38 = vadd.s32 12, %v51_v19 }
  0x31   :  { %1177 = vset.pattern.permute.xlu1 %v1237_v3  ;;  %1178 = vset.pattern.permute.xlu2 %v1238_v6 }
  0x32   :  { %198 = vperm.xlu1 %1177, %v171_v20   ;;  %323 = vperm.xlu2 %1178, %v298_v21  }
  0x37   :  { %329 = vperm.xlu0 %1179, %v300_v23  }
  0x3a   :  { %1180 = vset.pattern.permute.xlu1 %v1236_v2  ;;  %1181 = vset.pattern.permute.xlu2 %v1236_v2 }
  0x3b   :  { %73 = vperm.xlu1 %1180, %v42_v22   ;;  %76 = vperm.xlu2 %1181, %v43_v24  }
  0x3f   :  { %1186 = vset.pattern.permute.xlu0 %v1236_v2 }
  0x40   :  { %82 = vperm.xlu0 %1186, %v45_v25   ;;  %v180_v25 = vadd.s32 5, %v1391_v51 }
  0x43   :  { %1182 = vset.pattern.permute.xlu1 %v1237_v3  ;;  %1183 = vset.pattern.permute.xlu2 %v1237_v3 }
  0x44   :  { %201 = vperm.xlu1 %1182, %v172_v26   ;;  %204 = vperm.xlu2 %1183, %v173_v27   ;;  %v181_v26 = vadd.s32 5, %v51_v19 }
  0x48   :  { %85 = vperm.xlu0 %1186, %v46_v28  }
  0x4c   :  { %1184 = vset.pattern.permute.xlu1 %v1238_v6  ;;  %1185 = vset.pattern.permute.xlu2 %v1236_v2 }
  0x4d   :  { %332 = vperm.xlu1 %1184, %v301_v30   ;;  %79 = vperm.xlu2 %1185, %v44_v33  }
  0x50   :  { %1193 = vset.pattern.permute.xlu0 %v1237_v3 }
  0x51   :  { %216 = vperm.xlu0 %1193, %v177_v34  }
  0x55   :  { %1187 = vset.pattern.permute.xlu1 %v1237_v3  ;;  %1188 = vset.pattern.permute.xlu2 %v1237_v3 }
  0x56   :  { %207 = vperm.xlu1 %1187, %v174_v36   ;;  %210 = vperm.xlu2 %1188, %v175_v37  }
  0x59   :  { %219 = vperm.xlu0 %1193, %v178_v41  }
  0x5e   :  { %1189 = vset.pattern.permute.xlu1 %v1238_v6  ;;  %1190 = vset.pattern.permute.xlu2 %v1238_v6 }
  0x5f   :  { %335 = vperm.xlu1 %1189, %v302_v42   ;;  %338 = vperm.xlu2 %1190, %v303_v43  }
  0x60   :  { %v312_v50 = vpop.permute.xlu2 %311 }
  0x61   :  { %1200 = vset.pattern.permute.xlu0 %v1238_v6  ;;  %vm358_vm2 = vcmp.eq.s32.totalorder %v1397_v57, %v312_v50 }
  0x62   :  { %350 = vperm.xlu0 %1200, %v307_v47   ;;  %v1018_v9 = vsel %vm358_vm2, 1.0, %v1239_v61 }
  0x67   :  { %1191 = vset.pattern.permute.xlu1 %v1236_v2  ;;  %1192 = vset.pattern.permute.xlu2 %v1237_v3 }
  0x68   :  { %88 = vperm.xlu1 %1191, %v47_v31   ;;  %213 = vperm.xlu2 %1192, %v176_v48   ;;  %v315_v55 = vpop.permute.xlu2 %314 }
  0x69   :  { %vm359_vm4 = vcmp.eq.s32.totalorder %v1397_v57, %v315_v55 }
  0x6a   :  { %353 = vperm.xlu0 %1200, %v308_v52   ;;  %v1019_v12 = vsel %vm359_vm4, 1.0, %v1239_v61 }
  0x70   :  { %1194 = vset.pattern.permute.xlu1 %v1238_v6  ;;  %1195 = vset.pattern.permute.xlu2 %v1238_v6 }
  0x71   :  { %341 = vperm.xlu1 %1194, %v304_v53   ;;  %344 = vperm.xlu2 %1195, %v305_v54   ;;  %v190_v60 = vpop.permute.xlu2 %189 }
  0x72   :  { %1207 = vset.pattern.permute.xlu0 %v1236_v2  ;;  %vm232_vm6 = vcmp.eq.s32.totalorder %v1397_v57, %v190_v60 }
  0x73   :  { %v1004_v20 = vsel %vm232_vm6, 1.0, %v1239_v61 }
  0x77   :  { %v56_v58 = vpop.permute.xlu0 %55 }
  0x78   :  { %v184_v59 = vpop.permute.xlu1 %183  ;;  %vm102_vm0 = vcmp.eq.s32.totalorder %v1397_v57, %v56_v58 }
  0x79   :  { %1196 = vset.pattern.permute.xlu1 %v1236_v2  ;;  %1197 = vset.pattern.permute.xlu2 %v1236_v2  ;;  %vm230_vm1 = vcmp.eq.s32.totalorder %v1397_v57, %v184_v59  ;;  %v986_v62 = vsel %vm102_vm0, 1.0, %v1239_v61 }
  0x7a   :  { %91 = vperm.xlu1 %1196, %v48_v39   ;;  %94 = vperm.xlu2 %1197, %v49_v46   ;;  %v1002_v63 = vsel %vm230_vm1, 1.0, %v1239_v61  ;;  %v321_v15 = vpop.permute.xlu2 %320 }
  0x7b   :  { %v278_v7 = vadd.f32 %v1002_v63, %v986_v62  ;;  %vm361_vm9 = vcmp.eq.s32.totalorder %v1397_v57, %v321_v15 }
  0x7c   :  { %v1021_v28 = vsel %vm361_vm9, 1.0, %v1239_v61 }
  0x7d   :  { %v406_v13 = vadd.f32 %v1018_v9, %v278_v7 }
  0x7f   :  { %v59_v0 = vpop.permute.xlu0 %58 }
  0x80   :  { %vm103_vm3 = vcmp.eq.s32.totalorder %v1397_v57, %v59_v0  ;;  %v187_v5 = vpop.permute.xlu1 %186 }
  0x81   :  { %v987_v8 = vsel %vm103_vm3, 1.0, %v1239_v61  ;;  %vm231_vm5 = vcmp.eq.s32.totalorder %v1397_v57, %v187_v5 }
  0x82   :  { %v1003_v10 = vsel %vm231_vm5, 1.0, %v1239_v61  ;;  %1198 = vset.pattern.permute.xlu1 %v1237_v3  ;;  %1199 = vset.pattern.permute.xlu2 %v1238_v6 }
  0x83   :  { %v279_v11 = vadd.f32 %v1003_v10, %v987_v8  ;;  %222 = vperm.xlu1 %1198, %v179_v1   ;;  %347 = vperm.xlu2 %1199, %v306_v4   ;;  %v71_v22 = vpop.permute.xlu2 %70 }
  0x84   :  { %vm107_vm14 = vcmp.eq.s32.totalorder %v1397_v57, %v71_v22 }
  0x85   :  { %v407_v14 = vadd.f32 %v1019_v12, %v279_v11 }
  0x87   :  { %v62_v16 = vpop.permute.xlu0 %61  ;;  %v422_v17 = vpack.c.bf16 %v407_v14, %v406_v13 }
  0x88   :  { %vm104_vm7 = vcmp.eq.s32.totalorder %v1397_v57, %v62_v16 }
  0x89   :  { %502 = vmatmul.bf16.vlgmr.msra.gmra.mxu0 %v422_v17  ;;  %v65_v18 = vpop.permute.xlu1 %64  ;;  %v988_v21 = vsel %vm104_vm7, 1.0, %v1239_v61 }
  0x8a   :  { %vm105_vm8 = vcmp.eq.s32.totalorder %v1397_v57, %v65_v18  ;;  %v280_v24 = vadd.f32 %v1004_v20, %v988_v21 }
  0x8b   :  { %1201 = vset.pattern.permute.xlu1 %v1236_v2  ;;  %1202 = vset.pattern.permute.xlu2 %v1236_v2  ;;  %v989_v27 = vsel %vm105_vm8, 1.0, %v1239_v61 }
  0x8c   :  { %97 = vperm.xlu1 %1201, %v1391_v51   ;;  %100 = vperm.xlu2 %1202, %v51_v19   ;;  %v324_v37 = vpop.permute.xlu2 %323  ;;  %v1153_v19 = vld [vmem:[%s1650_s3 + $0x38] sm:$0xff] }
  0x8d   :  { %vm362_vm15 = vcmp.eq.s32.totalorder %v1397_v57, %v324_v37  ;;  %718 = vmatpush.bf16.msra.mxu2 %v1153_v19 }
  0x8e   :  { %v1022_v44 = vsel %vm362_vm15, 1.0, %v1239_v61 }
  0x90   :  { %v193_v23 = vpop.permute.xlu0 %192 }
  0x91   :  { %vm233_vm10 = vcmp.eq.s32.totalorder %v1397_v57, %v193_v23 }
  0x92   :  { %v1005_v29 = vsel %vm233_vm10, 1.0, %v1239_v61  ;;  %v318_v30 = vpop.permute.xlu1 %317 }
  0x93   :  { %v281_v31 = vadd.f32 %v1005_v29, %v989_v27  ;;  %vm360_vm11 = vcmp.eq.s32.totalorder %v1397_v57, %v318_v30  ;;  %v1152_v27 = vld [vmem:[%s1650_s3 + $0x30] sm:$0xff]  ;;  %v1151_v29 = vld [vmem:[%s1650_s3 + $0x28] sm:$0xff] }
  0x94   :  { %v1020_v32 = vsel %vm360_vm11, 1.0, %v1239_v61  ;;  %1203 = vset.pattern.permute.xlu1 %v1237_v3  ;;  %1204 = vset.pattern.permute.xlu2 %v1237_v3 }
  0x95   :  { %v408_v33 = vadd.f32 %v1020_v32, %v280_v24  ;;  %225 = vperm.xlu1 %1203, %v180_v25   ;;  %v409_v34 = vadd.f32 %v1021_v28, %v281_v31  ;;  %228 = vperm.xlu2 %1204, %v181_v26   ;;  %v77_v40 = vpop.permute.xlu2 %76  ;;  %v1150_v32 = vld [vmem:[%s1650_s3 + $0x20] sm:$0xff] }
  0x96   :  { %vm109_vm3 = vcmp.eq.s32.totalorder %v1397_v57, %v77_v40  ;;  %719 = vmatpush.bf16.msra.mxu2 %v1152_v27 }
  0x97   :  { %v423_v35 = vpack.c.bf16 %v409_v34, %v408_v33  ;;  %v993_v58 = vsel %vm109_vm3, 1.0, %v1239_v61 }
  0x98   :  { %v196_v36 = vpop.permute.xlu0 %195 }
  0x99   :  { %507 = vmatmul.bf16.gmra.mxu0 %v423_v35  ;;  %vm234_vm12 = vcmp.eq.s32.totalorder %v1397_v57, %v196_v36  ;;  %v1149_v36 = vld [vmem:[%s1650_s3 + $0x18] sm:$0xff] }
  0x9a   :  { %v1006_v41 = vsel %vm234_vm12, 1.0, %v1239_v61  ;;  %720 = vmatpush.bf16.msra.mxu2 %v1151_v29 }
  0x9b   :  { %v68_v39 = vpop.permute.xlu1 %67 }
  0x9c   :  { %vm106_vm13 = vcmp.eq.s32.totalorder %v1397_v57, %v68_v39 }
  0x9d   :  { %1205 = vset.pattern.permute.xlu1 %v1238_v6  ;;  %1206 = vset.pattern.permute.xlu2 %v1236_v2  ;;  %v990_v42 = vsel %vm106_vm13, 1.0, %v1239_v61  ;;  %v991_v2 = vsel %vm107_vm14, 1.0, %v1239_v61 }
  0x9e   :  { %356 = vperm.xlu1 %1205, %v309_v38   ;;  %v282_v43 = vadd.f32 %v1006_v41, %v990_v42  ;;  %v205_v51 = vpop.permute.xlu2 %204  ;;  %721 = vmatpush.bf16.msra.mxu2 %v1150_v32  ;;  %v1148_v42 = vld [vmem:[%s1650_s3 + $0x10] sm:$0xff] }
  0x9f   :  { %vm237_vm5 = vcmp.eq.s32.totalorder %v1397_v57, %v205_v51 }
  0xa0   :  { %v410_v48 = vadd.f32 %v1022_v44, %v282_v43  ;;  %v1009_v60 = vsel %vm237_vm5, 1.0, %v1239_v61 }
  0xa1   :  { %v327_v3 = vpop.permute.xlu0 %326  ;;  %v285_v4 = vadd.f32 %v1009_v60, %v993_v58  ;;  %v568_v58 = vld [vmem:[%s1648_s1 + $0x8] sm:$0xff] }
  0xa2   :  { %vm363_vm0 = vcmp.eq.s32.totalorder %v1397_v57, %v327_v3  ;;  %722 = vmatpush.bf16.msra.mxu2 %v1149_v36 }
  0xa3   :  { %v1023_v46 = vsel %vm363_vm0, 1.0, %v1239_v61 }
  0xa4   :  { %v199_v6 = vpop.permute.xlu1 %198 }
  0xa5   :  { %vm235_vm1 = vcmp.eq.s32.totalorder %v1397_v57, %v199_v6 }
  0xa6   :  { %v1007_v45 = vsel %vm235_vm1, 1.0, %v1239_v61  ;;  %723 = vmatpush.bf16.msra.mxu2 %v1148_v42  ;;  %v575_v42 = vld [vmem:[%s1648_s1 + $0x40] sm:$0xff] }
  0xa7   :  { %v283_v47 = vadd.f32 %v1007_v45, %v991_v2  ;;  %v80_v53 = vpop.permute.xlu2 %79 }
  0xa8   :  { %vm110_vm12 = vcmp.eq.s32.totalorder %v1397_v57, %v80_v53 }
  0xa9   :  { %v411_v49 = vadd.f32 %v1023_v46, %v283_v47  ;;  %v330_v55 = vpop.permute.xlu0 %329  ;;  %v994_v20 = vsel %vm110_vm12, 1.0, %v1239_v61  ;;  %v1147_v46 = vld [vmem:[%s1650_s3 + $0x8] sm:$0xff] }
  0xaa   :  { %vm364_vm6 = vcmp.eq.s32.totalorder %v1397_v57, %v330_v55  ;;  %724 = vmatpush.bf16.msra.mxu2 %v1147_v46  ;;  %v577_v46 = vld [vmem:[%s1648_s1 + $0x50] sm:$0xff] }
  0xab   :  { %v424_v50 = vpack.c.bf16 %v411_v49, %v410_v48  ;;  %v1024_v63 = vsel %vm364_vm6, 1.0, %v1239_v61  ;;  %v1146_v49 = vld [vmem:[%s1650_s3] sm:$0xff]  ;;  %vm617_vm6 = vcmask 1041408   ;;  %s975_s3 = sshll.u32 %s1240_s29, 4  ;;  %s976_s3 = int_to_ptr.vmem [resolvable:$true] %s975_s3 }
  0xad   :  { %512 = vmatmul.bf16.gmra.mxu0 %v424_v50  ;;  %v74_v52 = vpop.permute.xlu1 %73 }
  0xae   :  { %vm108_vm4 = vcmp.eq.s32.totalorder %v1397_v57, %v74_v52  ;;  %725 = vmatpush.bf16.msra.mxu2 %v1146_v49  ;;  %v591_v52 = vld [vmem:[%s1651_s4] sm:$0x3] }
  0xaf   :  { %v992_v59 = vsel %vm108_vm4, 1.0, %v1239_v61  ;;  %v619_v55 = vsel %vm617_vm6, %v591_v52, 0  ;;  %v1161_v52 = vld [vmem:[%s1652_s5 + $0x38] sm:$0xff] }
  0xb0   :  { %v211_v1 = vpop.permute.xlu2 %210  ;;  %628 = vmatpush.bf16.msra.mxu1 %v619_v55  ;;  %875 = vmatpush.bf16.msra.mxu3 %v1161_v52  ;;  %v580_v55 = vld [vmem:[%s1648_s1 + $0x68] sm:$0xff] }
  0xb1   :  { %vm239_vm8 = vcmp.eq.s32.totalorder %v1397_v57, %v211_v1 }
  0xb2   :  { %v83_v10 = vpop.permute.xlu0 %82  ;;  %v1011_v13 = vsel %vm239_vm8, 1.0, %v1239_v61 }
  0xb3   :  { %vm111_vm9 = vcmp.eq.s32.totalorder %v1397_v57, %v83_v10 }
  0xb4   :  { %v995_v14 = vsel %vm111_vm9, 1.0, %v1239_v61 }
  0xb5   :  { %v287_v15 = vadd.f32 %v1011_v13, %v995_v14  ;;  %v570_v13 = vld [vmem:[%s1648_s1 + $0x18] sm:$0xff] }
  0xb6   :  { %v202_v54 = vpop.permute.xlu1 %201 }
  0xb7   :  { %vm236_vm2 = vcmp.eq.s32.totalorder %v1397_v57, %v202_v54 }
  0xb8   :  { %v1008_v56 = vsel %vm236_vm2, 1.0, %v1239_v61 }
  0xb9   :  { %v284_v62 = vadd.f32 %v1008_v56, %v992_v59  ;;  %v339_v12 = vpop.permute.xlu2 %338  ;;  %v567_v56 = vld [vmem:[%s1648_s1] sm:$0xff] }
  0xba   :  { %vm367_vm11 = vcmp.eq.s32.totalorder %v1397_v57, %v339_v12  ;;  %v86_v18 = vpop.permute.xlu0 %85  ;;  %v583_v60 = vpack.c.bf16 %v568_v58, %v567_v56  ;;  %v569_v12 = vld [vmem:[%s1648_s1 + $0x10] sm:$0xff] }
  0xbb   :  { %v412_v7 = vadd.f32 %v1024_v63, %v284_v62  ;;  %v1027_v17 = vsel %vm367_vm11, 1.0, %v1239_v61  ;;  %vm112_vm0 = vcmp.eq.s32.totalorder %v1397_v57, %v86_v18  ;;  %vm592_vm11 = vcmask 31744  }
  0xbc   :  { %v415_v23 = vadd.f32 %v1027_v17, %v287_v15  ;;  %v996_v37 = vsel %vm112_vm0, 1.0, %v1239_v61  ;;  %1066 = vmatmul.msk.bf16.vlgmr.msra.gmra.mxu1 %vm592_vm11, %v583_v60  ;;  %v584_v14 = vpack.c.bf16 %v570_v13, %v569_v12  ;;  %v1158_v60 = vld [vmem:[%s1652_s5 + $0x20] sm:$0xff] }
  0xbf   :  { %v333_v0 = vpop.permute.xlu1 %332 }
  0xc0   :  { %vm365_vm7 = vcmp.eq.s32.totalorder %v1397_v57, %v333_v0 }
  0xc1   :  { %v1025_v5 = vsel %vm365_vm7, 1.0, %v1239_v61 }
  0xc2   :  { %v413_v8 = vadd.f32 %v1025_v5, %v285_v4  ;;  %v214_v25 = vpop.permute.xlu2 %213 }
  0xc3   :  { %v217_v30 = vpop.permute.xlu0 %216  ;;  %vm240_vm1 = vcmp.eq.s32.totalorder %v1397_v57, %v214_v25 }
  0xc4   :  { %v425_v9 = vpack.c.bf16 %v413_v8, %v412_v7  ;;  %vm241_vm14 = vcmp.eq.s32.totalorder %v1397_v57, %v217_v30  ;;  %v1012_v38 = vsel %vm240_vm1, 1.0, %v1239_v61 }
  0xc5   :  { %v1013_v34 = vsel %vm241_vm14, 1.0, %v1239_v61  ;;  %v288_v41 = vadd.f32 %v1012_v38, %v996_v37  ;;  %v573_v38 = vld [vmem:[%s1648_s1 + $0x30] sm:$0xff] }
  0xc6   :  { %517 = vmatmul.bf16.gmra.mxu0 %v425_v9 }
  0xc8   :  { %v208_v11 = vpop.permute.xlu1 %207 }
  0xc9   :  { %vm238_vm10 = vcmp.eq.s32.totalorder %v1397_v57, %v208_v11 }
  0xca   :  { %v1010_v16 = vsel %vm238_vm10, 1.0, %v1239_v61 }
  0xcb   :  { %v286_v22 = vadd.f32 %v1010_v16, %v994_v20  ;;  %v345_v33 = vpop.permute.xlu2 %344  ;;  %v220_v47 = vpop.permute.xlu0 %219 }
  0xcc   :  { %vm369_vm2 = vcmp.eq.s32.totalorder %v1397_v57, %v345_v33  ;;  %vm242_vm4 = vcmp.eq.s32.totalorder %v1397_v57, %v220_v47  ;;  %1067 = vmatmul.msk.bf16.gmra.mxu1 %vm592_vm11, %v584_v14  ;;  %v571_v33 = vld [vmem:[%s1648_s1 + $0x20] sm:$0xff]  ;;  %v578_v47 = vld [vmem:[%s1648_s1 + $0x58] sm:$0xff] }
  0xcd   :  { %v1029_v3 = vsel %vm369_vm2, 1.0, %v1239_v61  ;;  %v1014_v53 = vsel %vm242_vm4, 1.0, %v1239_v61 }
  0xd1   :  { %v336_v21 = vpop.permute.xlu1 %335 }
  0xd2   :  { %vm366_vm13 = vcmp.eq.s32.totalorder %v1397_v57, %v336_v21 }
  0xd3   :  { %v1026_v24 = vsel %vm366_vm13, 1.0, %v1239_v61 }
  0xd4   :  { %v414_v26 = vadd.f32 %v1026_v24, %v286_v22  ;;  %v95_v44 = vpop.permute.xlu2 %94  ;;  %v351_v51 = vpop.permute.xlu0 %350 }
  0xd5   :  { %vm115_vm7 = vcmp.eq.s32.totalorder %v1397_v57, %v95_v44  ;;  %vm371_vm9 = vcmp.eq.s32.totalorder %v1397_v57, %v351_v51 }
  0xd6   :  { %v426_v28 = vpack.c.bf16 %v415_v23, %v414_v26  ;;  %v999_v63 = vsel %vm115_vm7, 1.0, %v1239_v61  ;;  %v1031_v4 = vsel %vm371_vm9, 1.0, %v1239_v61 }
  0xd8   :  { %522 = vmatmul.bf16.gmra.mxu0 %v426_v28 }
  0xda   :  { %v89_v31 = vpop.permute.xlu1 %88 }
  0xdb   :  { %vm113_vm15 = vcmp.eq.s32.totalorder %v1397_v57, %v89_v31 }
  0xdc   :  { %v997_v35 = vsel %vm113_vm15, 1.0, %v1239_v61  ;;  %v354_v18 = vpop.permute.xlu0 %353 }
  0xdd   :  { %v289_v39 = vadd.f32 %v1013_v34, %v997_v35  ;;  %v348_v50 = vpop.permute.xlu2 %347  ;;  %vm372_vm0 = vcmp.eq.s32.totalorder %v1397_v57, %v354_v18  ;;  %v572_v34 = vld [vmem:[%s1648_s1 + $0x28] sm:$0xff]  ;;  %v1620_v18 = vld [vmem:[%s1653_s6] ss:$0 sm:$0xff] }
  0xde   :  { %vm370_vm8 = vcmp.eq.s32.totalorder %v1397_v57, %v348_v50  ;;  %v1032_v28 = vsel %vm372_vm0, 1.0, %v1239_v61  ;;  %v585_v36 = vpack.c.bf16 %v572_v34, %v571_v33 }
  0xdf   :  { %v417_v43 = vadd.f32 %v1029_v3, %v289_v39  ;;  %v1030_v0 = vsel %vm370_vm8, 1.0, %v1239_v61  ;;  %v574_v39 = vld [vmem:[%s1648_s1 + $0x38] sm:$0xff] }
  0xe0   :  { %1068 = vmatmul.msk.bf16.gmra.mxu1 %vm592_vm11, %v585_v36  ;;  %v586_v3 = vpack.c.bf16 %v574_v39, %v573_v38 }
  0xe3   :  { %v342_v40 = vpop.permute.xlu1 %341 }
  0xe4   :  { %vm368_vm3 = vcmp.eq.s32.totalorder %v1397_v57, %v342_v40 }
  0xe5   :  { %v1028_v6 = vsel %vm368_vm3, 1.0, %v1239_v61 }
  0xe6   :  { %v416_v2 = vadd.f32 %v1028_v6, %v288_v41  ;;  %v101_v10 = vpop.permute.xlu2 %100  ;;  %v576_v6 = vld [vmem:[%s1648_s1 + $0x48] sm:$0xff] }
  0xe7   :  { %vm117_vm13 = vcmp.eq.s32.totalorder %v1397_v57, %v101_v10  ;;  %v1154_v10 = vld [vmem:[%s1652_s5] sm:$0xff] }
  0xe8   :  { %v427_v45 = vpack.c.bf16 %v417_v43, %v416_v2  ;;  %v1001_v20 = vsel %vm117_vm13, 1.0, %v1239_v61  ;;  %v587_v43 = vpack.c.bf16 %v576_v6, %v575_v42 }
  0xea   :  { %527 = vmatmul.bf16.gmra.mxu0 %v427_v45 }
  0xec   :  { %v92_v48 = vpop.permute.xlu1 %91 }
  0xed   :  { %vm114_vm5 = vcmp.eq.s32.totalorder %v1397_v57, %v92_v48  ;;  %v588_v48 = vpack.c.bf16 %v578_v47, %v577_v46 }
  0xee   :  { %v998_v54 = vsel %vm114_vm5, 1.0, %v1239_v61 }
  0xef   :  { %v290_v62 = vadd.f32 %v1014_v53, %v998_v54  ;;  %v229_v17 = vpop.permute.xlu2 %228  ;;  %v1160_v53 = vld [vmem:[%s1652_s5 + $0x30] sm:$0xff]  ;;  %v579_v54 = vld [vmem:[%s1648_s1 + $0x60] sm:$0xff] }
  0xf0   :  { %vm245_vm15 = vcmp.eq.s32.totalorder %v1397_v57, %v229_v17  ;;  %1069 = vmatmul.msk.bf16.gmra.mxu1 %vm592_vm11, %v586_v3  ;;  %v589_v58 = vpack.c.bf16 %v580_v55, %v579_v54  ;;  %876 = vmatpush.bf16.msra.mxu3 %v1160_v53 }
  0xf1   :  { %v418_v7 = vadd.f32 %v1030_v0, %v290_v62  ;;  %v1017_v22 = vsel %vm245_vm15, 1.0, %v1239_v61  ;;  %v1157_v0 = vld [vmem:[%s1652_s5 + $0x18] sm:$0xff] }
  0xf2   :  { %v293_v27 = vadd.f32 %v1017_v22, %v1001_v20 }
  0xf5   :  { %v223_v59 = vpop.permute.xlu1 %222 }
  0xf6   :  { %vm243_vm10 = vcmp.eq.s32.totalorder %v1397_v57, %v223_v59  ;;  %v1159_v59 = vld [vmem:[%s1652_s5 + $0x28] sm:$0xff] }
  0xf7   :  { %v1015_v1 = vsel %vm243_vm10, 1.0, %v1239_v61  ;;  %877 = vmatpush.bf16.msra.mxu3 %v1159_v59 }
  0xf8   :  { %v291_v5 = vadd.f32 %v1015_v1, %v999_v63  ;;  %v1156_v1 = vld [vmem:[%s1652_s5 + $0x10] sm:$0xff] }
  0xfa   :  { %v419_v8 = vadd.f32 %v1031_v4, %v291_v5  ;;  %v581_v4 = vld [vmem:[%s1648_s1 + $0x70] sm:$0xff]  ;;  %v582_v5 = vld [vmem:[%s1648_s1 + $0x78] sm:$0xff] }
  0xfb   :  { %878 = vmatpush.bf16.msra.mxu3 %v1158_v60 }
  0xfc   :  { %v428_v9 = vpack.c.bf16 %v419_v8, %v418_v7  ;;  %v590_v8 = vpack.c.bf16 %v582_v5, %v581_v4 }
  0xfe   :  { %532 = vmatmul.bf16.gmra.mxu0 %v428_v9  ;;  %v98_v11 = vpop.permute.xlu1 %97  ;;  %v1155_v9 = vld [vmem:[%s1652_s5 + $0x8] sm:$0xff] }
  0xff   :  { %vm116_vm14 = vcmp.eq.s32.totalorder %v1397_v57, %v98_v11  ;;  %879 = vmatpush.bf16.msra.mxu3 %v1157_v0 }
 0x100   :  { %v1000_v21 = vsel %vm116_vm14, 1.0, %v1239_v61  ;;  %1070 = vmatmul.msk.bf16.gmra.mxu1 %vm592_vm11, %v587_v43 }
 0x103   :  { %880 = vmatpush.bf16.msra.mxu3 %v1156_v1 }
 0x106   :  { %v503_v15 = vpop.f32.mrf.mxu0 }
 0x107   :  { %v226_v16 = vpop.permute.xlu1 %225  ;;  %881 = vmatpush.bf16.msra.mxu3 %v1155_v9 }
 0x108   :  { %vm244_vm12 = vcmp.eq.s32.totalorder %v1397_v57, %v226_v16 }
 0x109   :  { %v1016_v19 = vsel %vm244_vm12, 1.0, %v1239_v61 }
 0x10a   :  { %v292_v24 = vadd.f32 %v1016_v19, %v1000_v21 }
 0x10b   :  { %882 = vmatpush.bf16.msra.mxu3 %v1154_v10 }
 0x10c   :  { %v420_v31 = vadd.f32 %v1032_v28, %v292_v24 }
 0x10e   :  { %v505_v23 = vpop.f32.mrf.mxu0 }
 0x10f   :  { %v543_v25 = vpack.c.bf16 %v505_v23, %v503_v15 }
 0x110   :  { %v357_v26 = vpop.permute.xlu1 %356  ;;  %1071 = vmatmul.msk.bf16.gmra.mxu1 %vm592_vm11, %v588_v48 }
 0x111   :  { %vm373_vm1 = vcmp.eq.s32.totalorder %v1397_v57, %v357_v26  ;;  %726 = vmatmul.bf16.vlgmr.msra.gmra.mxu2 %v543_v25 }
 0x112   :  { %v1033_v29 = vsel %vm373_vm1, 1.0, %v1239_v61 }
 0x113   :  { %v421_v30 = vadd.f32 %v1033_v29, %v293_v27 }
 0x115   :  { %v429_v32 = vpack.c.bf16 %v421_v30, %v420_v31 }
 0x116   :  { %v508_v35 = vpop.f32.mrf.mxu0 }
 0x117   :  { %537 = vmatmul.bf16.gmra.mxu0 %v429_v32 }
 0x11e   :  { %v510_v57 = vpop.f32.mrf.mxu0 }
 0x11f   :  { %v544_v37 = vpack.c.bf16 %v510_v57, %v508_v35 }
 0x120   :  { %1072 = vmatmul.msk.bf16.gmra.mxu1 %vm592_vm11, %v589_v58 }
 0x121   :  { %731 = vmatmul.bf16.gmra.mxu2 %v544_v37 }
 0x12a   :  { %v513_v61 = vpop.f32.mrf.mxu0 }
 0x130   :  { %1073 = vmatmul.msk.bf16.gmra.mxu1 %vm592_vm11, %v590_v8 }
 0x132   :  { %v515_v40 = vpop.f32.mrf.mxu0 }
 0x133   :  { %v545_v41 = vpack.c.bf16 %v515_v40, %v513_v61 }
 0x135   :  { %736 = vmatmul.bf16.gmra.mxu2 %v545_v41 }
 0x139   :  { %v630_v13 = vpop.f32.mrf.mxu1 }
 0x141   :  { %v632_v16 = vpop.f32.mrf.mxu1 }
 0x143   :  { %v518_v2 = vpop.f32.mrf.mxu0 }
 0x149   :  { %v635_v25 = vpop.f32.mrf.mxu1 }
 0x14b   :  { %v520_v44 = vpop.f32.mrf.mxu0 }
 0x14c   :  { %v546_v45 = vpack.c.bf16 %v520_v44, %v518_v2 }
 0x14e   :  { %741 = vmatmul.bf16.gmra.mxu2 %v546_v45 }
 0x151   :  { %v637_v31 = vpop.f32.mrf.mxu1 }
 0x155   :  { %v523_v49 = vpop.f32.mrf.mxu0 }
 0x15d   :  { %v525_v50 = vpop.f32.mrf.mxu0  ;;  %v640_v61 = vpop.f32.mrf.mxu1 }
 0x15e   :  { %v547_v51 = vpack.c.bf16 %v525_v50, %v523_v49 }
 0x160   :  { %746 = vmatmul.bf16.gmra.mxu2 %v547_v51 }
 0x165   :  { %v642_v3 = vpop.f32.mrf.mxu1 }
 0x167   :  { %v528_v56 = vpop.f32.mrf.mxu0 }
 0x16d   :  { %v645_v45 = vpop.f32.mrf.mxu1 }
 0x16f   :  { %v530_v62 = vpop.f32.mrf.mxu0 }
 0x170   :  { %v548_v63 = vpack.c.bf16 %v530_v62, %v528_v56 }
 0x172   :  { %751 = vmatmul.bf16.gmra.mxu2 %v548_v63 }
 0x175   :  { %v647_v48 = vpop.f32.mrf.mxu1 }
 0x17b   :  { %v533_v7 = vpop.f32.mrf.mxu0 }
 0x17d   :  { %v650_v55 = vpop.f32.mrf.mxu1 }
 0x183   :  { %v535_v11 = vpop.f32.mrf.mxu0 }
 0x184   :  { %v549_v12 = vpack.c.bf16 %v535_v11, %v533_v7 }
 0x185   :  { %v652_v60 = vpop.f32.mrf.mxu1 }
 0x186   :  { %756 = vmatmul.bf16.gmra.mxu2 %v549_v12 }
 0x18d   :  { %v655_v7 = vpop.f32.mrf.mxu1 }
 0x194   :  { %v538_v14 = vpop.f32.mrf.mxu0  ;;  %v727_v15 = vpop.f32.mrf.mxu2 }
 0x195   :  { %v728_v17 = vadd.f32 %v727_v15, %v630_v13  ;;  %v657_v11 = vpop.f32.mrf.mxu1 }
 0x197   :  { %v769_v21 = vadd.f32 %v1620_v18, %v728_v17 }
 0x199   :  { %v785_v26 = vmax.f32 %v769_v21, 0.0 }
 0x19c   :  { %v540_v19 = vpop.f32.mrf.mxu0  ;;  %v729_v20 = vpop.f32.mrf.mxu2 }
 0x19d   :  { %v550_v22 = vpack.c.bf16 %v540_v19, %v538_v14  ;;  %v730_v23 = vadd.f32 %v729_v20, %v632_v16  ;;  %v660_v20 = vpop.f32.mrf.mxu1 }
 0x19f   :  { %v770_v24 = vadd.f32 %v1620_v18, %v730_v23  ;;  %761 = vmatmul.bf16.gmra.mxu2 %v550_v22 }
 0x1a1   :  { %v786_v27 = vmax.f32 %v770_v24, 0.0 }
 0x1a3   :  { %v801_v28 = vpack.c.bf16 %v786_v27, %v785_v26 }
 0x1a4   :  { %v732_v29 = vpop.f32.mrf.mxu2 }
 0x1a5   :  { %883 = vmatmul.bf16.vlgmr.msra.gmra.mxu3 %v801_v28  ;;  %v733_v30 = vadd.f32 %v732_v29, %v635_v25  ;;  %v662_v23 = vpop.f32.mrf.mxu1 }
 0x1a7   :  { %v771_v33 = vadd.f32 %v1620_v18, %v733_v30 }
 0x1a9   :  { %v787_v36 = vmax.f32 %v771_v33, 0.0 }
 0x1ac   :  { %v734_v32 = vpop.f32.mrf.mxu2 }
 0x1ad   :  { %v735_v34 = vadd.f32 %v734_v32, %v637_v31  ;;  %v665_v31 = vpop.f32.mrf.mxu1 }
 0x1af   :  { %v772_v35 = vadd.f32 %v1620_v18, %v735_v34 }
 0x1b1   :  { %v788_v57 = vmax.f32 %v772_v35, 0.0 }
 0x1b3   :  { %v802_v37 = vpack.c.bf16 %v788_v57, %v787_v36 }
 0x1b5   :  { %888 = vmatmul.bf16.gmra.mxu3 %v802_v37  ;;  %v667_v35 = vpop.f32.mrf.mxu1  ;;  %v1209_v37 = vld [vmem:[%s1653_s6 + $0x1] ss:$0 sm:$0xff] }
 0x1b8   :  { %v737_v38 = vpop.f32.mrf.mxu2 }
 0x1b9   :  { %v738_v39 = vadd.f32 %v737_v38, %v640_v61 }
 0x1bb   :  { %v773_v41 = vadd.f32 %v1620_v18, %v738_v39 }
 0x1bd   :  { %v789_v43 = vmax.f32 %v773_v41, 0.0 }
 0x1c0   :  { %v739_v40 = vpop.f32.mrf.mxu2 }
 0x1c1   :  { %v740_v42 = vadd.f32 %v739_v40, %v642_v3 }
 0x1c3   :  { %v774_v6 = vadd.f32 %v1620_v18, %v740_v42 }
 0x1c5   :  { %v790_v2 = vmax.f32 %v774_v6, 0.0 }
 0x1c7   :  { %v803_v44 = vpack.c.bf16 %v790_v2, %v789_v43 }
 0x1c9   :  { %893 = vmatmul.bf16.gmra.mxu3 %v803_v44 }
 0x1d1   :  { %v742_v46 = vpop.f32.mrf.mxu2 }
 0x1d2   :  { %v743_v47 = vadd.f32 %v742_v46, %v645_v45 }
 0x1d4   :  { %v775_v50 = vadd.f32 %v1620_v18, %v743_v47 }
 0x1d6   :  { %v791_v53 = vmax.f32 %v775_v50, 0.0 }
 0x1d9   :  { %v744_v49 = vpop.f32.mrf.mxu2 }
 0x1da   :  { %v745_v51 = vadd.f32 %v744_v49, %v647_v48 }
 0x1dc   :  { %v776_v52 = vadd.f32 %v1620_v18, %v745_v51 }
 0x1de   :  { %v792_v54 = vmax.f32 %v776_v52, 0.0 }
 0x1e0   :  { %v804_v56 = vpack.c.bf16 %v792_v54, %v791_v53 }
 0x1e2   :  { %898 = vmatmul.bf16.gmra.mxu3 %v804_v56 }
 0x1e3   :  { %v747_v58 = vpop.f32.mrf.mxu2 }
 0x1e4   :  { %v748_v59 = vadd.f32 %v747_v58, %v650_v55 }
 0x1e6   :  { %v777_v63 = vadd.f32 %v1620_v18, %v748_v59 }
 0x1e8   :  { %v793_v4 = vmax.f32 %v777_v63, 0.0 }
 0x1eb   :  { %v749_v62 = vpop.f32.mrf.mxu2 }
 0x1ec   :  { %v750_v0 = vadd.f32 %v749_v62, %v652_v60 }
 0x1ee   :  { %v778_v1 = vadd.f32 %v1620_v18, %v750_v0 }
 0x1f0   :  { %v794_v5 = vmax.f32 %v778_v1, 0.0 }
 0x1f2   :  { %v805_v8 = vpack.c.bf16 %v794_v5, %v793_v4 }
 0x1f4   :  { %903 = vmatmul.bf16.gmra.mxu3 %v805_v8 }
 0x1f5   :  { %v752_v9 = vpop.f32.mrf.mxu2 }
 0x1f6   :  { %v753_v10 = vadd.f32 %v752_v9, %v655_v7 }
 0x1f8   :  { %v779_v13 = vadd.f32 %v1620_v18, %v753_v10 }
 0x1fa   :  { %v795_v16 = vmax.f32 %v779_v13, 0.0 }
 0x1fd   :  { %v754_v12 = vpop.f32.mrf.mxu2 }
 0x1fe   :  { %v755_v14 = vadd.f32 %v754_v12, %v657_v11 }
 0x200   :  { %v780_v15 = vadd.f32 %v1620_v18, %v755_v14 }
 0x202   :  { %v796_v17 = vmax.f32 %v780_v15, 0.0 }
 0x204   :  { %v806_v19 = vpack.c.bf16 %v796_v17, %v795_v16 }
 0x206   :  { %908 = vmatmul.bf16.gmra.mxu3 %v806_v19 }
 0x209   :  { %v757_v21 = vpop.f32.mrf.mxu2 }
 0x20a   :  { %v758_v22 = vadd.f32 %v757_v21, %v660_v20 }
 0x20c   :  { %v781_v25 = vadd.f32 %v1620_v18, %v758_v22 }
 0x20e   :  { %v797_v28 = vmax.f32 %v781_v25, 0.0 }
 0x211   :  { %v759_v24 = vpop.f32.mrf.mxu2 }
 0x212   :  { %v760_v26 = vadd.f32 %v759_v24, %v662_v23 }
 0x214   :  { %v782_v27 = vadd.f32 %v1620_v18, %v760_v26 }
 0x216   :  { %v798_v29 = vmax.f32 %v782_v27, 0.0 }
 0x218   :  { %v807_v30 = vpack.c.bf16 %v798_v29, %v797_v28 }
 0x21a   :  { %913 = vmatmul.bf16.gmra.mxu3 %v807_v30 }
 0x222   :  { %v762_v32 = vpop.f32.mrf.mxu2 }
 0x223   :  { %v763_v33 = vadd.f32 %v762_v32, %v665_v31 }
 0x225   :  { %v783_v57 = vadd.f32 %v1620_v18, %v763_v33 }
 0x227   :  { %v799_v39 = vmax.f32 %v783_v57, 0.0 }
 0x228   :  { %v884_v34 = vpop.f32.mrf.mxu3 }
 0x229   :  { %v885_v3 = vadd.f32 %v1209_v37, %v884_v34 }
 0x22a   :  { %v764_v36 = vpop.f32.mrf.mxu2 }
 0x22b   :  { %v765_v61 = vadd.f32 %v764_v36, %v667_v35  ;;  %v924_v43 = vmax.f32 %v885_v3, 0.0  ;;  %v949_v35 = vld [vmem:[#allocation2] sm:$0x1] }
 0x22c   :  { %952 = vperm.xlu2 %1206, %v949_v35   ;;  %v948_v36 = vld [vmem:[%s1654_s7] sm:$0x1] }
 0x22d   :  { %v784_v38 = vadd.f32 %v1620_v18, %v765_v61 }
 0x22f   :  { %v800_v40 = vmax.f32 %v784_v38, 0.0 }
 0x230   :  { %v886_v41 = vpop.f32.mrf.mxu3 }
 0x231   :  { %v887_v42 = vadd.f32 %v1209_v37, %v886_v41  ;;  %v808_v6 = vpack.c.bf16 %v800_v40, %v799_v39 }
 0x233   :  { %v925_v2 = vmax.f32 %v887_v42, 0.0  ;;  %918 = vmatmul.bf16.gmra.mxu3 %v808_v6 }
 0x235   :  { %v940_v44 = vpack.c.bf16 %v925_v2, %v924_v43 }
 0x238   :  { %v889_v45 = vpop.f32.mrf.mxu3 }
 0x239   :  { %v890_v46 = vadd.f32 %v1209_v37, %v889_v45 }
 0x23b   :  { %v926_v49 = vmax.f32 %v890_v46, 0.0 }
 0x240   :  { %v891_v47 = vpop.f32.mrf.mxu3 }
 0x241   :  { %v892_v48 = vadd.f32 %v1209_v37, %v891_v47 }
 0x243   :  { %v927_v50 = vmax.f32 %v892_v48, 0.0 }
 0x245   :  { %v941_v51 = vpack.c.bf16 %v927_v50, %v926_v49 }
 0x24c   :  { %v894_v52 = vpop.f32.mrf.mxu3 }
 0x24d   :  { %v895_v53 = vadd.f32 %v1209_v37, %v894_v52 }
 0x24f   :  { %v928_v55 = vmax.f32 %v895_v53, 0.0 }
 0x254   :  { %v896_v18 = vpop.f32.mrf.mxu3 }
 0x255   :  { %v897_v54 = vadd.f32 %v1209_v37, %v896_v18 }
 0x257   :  { %v929_v56 = vmax.f32 %v897_v54, 0.0 }
 0x259   :  { %v942_v58 = vpack.c.bf16 %v929_v56, %v928_v55 }
 0x265   :  { %v899_v59 = vpop.f32.mrf.mxu3 }
 0x266   :  { %v900_v60 = vadd.f32 %v1209_v37, %v899_v59 }
 0x268   :  { %v930_v0 = vmax.f32 %v900_v60, 0.0 }
 0x26d   :  { %v901_v62 = vpop.f32.mrf.mxu3 }
 0x26e   :  { %v902_v63 = vadd.f32 %v1209_v37, %v901_v62 }
 0x270   :  { %v931_v1 = vmax.f32 %v902_v63, 0.0 }
 0x272   :  { %v943_v4 = vpack.c.bf16 %v931_v1, %v930_v0 }
 0x277   :  { %v904_v5 = vpop.f32.mrf.mxu3 }
 0x278   :  { %v905_v7 = vadd.f32 %v1209_v37, %v904_v5 }
 0x27a   :  { %v932_v10 = vmax.f32 %v905_v7, 0.0 }
 0x27f   :  { %v906_v8 = vpop.f32.mrf.mxu3 }
 0x280   :  { %v907_v9 = vadd.f32 %v1209_v37, %v906_v8 }
 0x282   :  { %v933_v11 = vmax.f32 %v907_v9, 0.0 }
 0x284   :  { %v944_v12 = vpack.c.bf16 %v933_v11, %v932_v10 }
 0x286   :  { %v953_v57 = vpop.permute.xlu2 %952 }
 0x287   :  { %v955_v61 = vperm.slane %v953_v57, 0 }
 0x289   :  { %v909_v13 = vpop.f32.mrf.mxu3 }
 0x28a   :  { %v910_v31 = vadd.f32 %v1209_v37, %v909_v13 }
 0x28c   :  { %v934_v33 = vmax.f32 %v910_v31, 0.0 }
 0x291   :  { %v911_v14 = vpop.f32.mrf.mxu3 }
 0x292   :  { %v912_v29 = vadd.f32 %v1209_v37, %v911_v14 }
 0x294   :  { %v935_v32 = vmax.f32 %v912_v29, 0.0 }
 0x296   :  { %v945_v34 = vpack.c.bf16 %v935_v32, %v934_v33 }
 0x29d   :  { %v914_v15 = vpop.f32.mrf.mxu3 }
 0x29e   :  { %v915_v26 = vadd.f32 %v1209_v37, %v914_v15 }
 0x2a0   :  { %v936_v28 = vmax.f32 %v915_v26, 0.0 }
 0x2a5   :  { %v916_v16 = vpop.f32.mrf.mxu3 }
 0x2a6   :  { %v917_v24 = vadd.f32 %v1209_v37, %v916_v16 }
 0x2a8   :  { %v937_v27 = vmax.f32 %v917_v24, 0.0 }
 0x2aa   :  { %v946_v30 = vpack.c.bf16 %v937_v27, %v936_v28 }
 0x2b6   :  { %v919_v17 = vpop.f32.mrf.mxu3 }
 0x2b7   :  { %v920_v19 = vadd.f32 %v1209_v37, %v919_v17 }
 0x2b9   :  { %v938_v22 = vmax.f32 %v920_v19, 0.0 }
 0x2be   :  { %v921_v20 = vpop.f32.mrf.mxu3 }
 0x2bf   :  { %v922_v21 = vadd.f32 %v1209_v37, %v921_v20 }
 0x2c1   :  { %v939_v23 = vmax.f32 %v922_v21, 0.0 }
 0x2c3   :  { %v947_v25 = vpack.c.bf16 %v939_v23, %v938_v22 }
 0x2c5   :  { %956 = vmatpush.bf16.xpose.msrb.mxu1 %v947_v25 }
 0x2cd   :  { %957 = vmatpush.bf16.xpose.msrb.mxu1 %v946_v30 }
 0x2d5   :  { %958 = vmatpush.bf16.xpose.msrb.mxu1 %v945_v34 }
 0x2dd   :  { %959 = vmatpush.bf16.xpose.msrb.mxu1 %v944_v12 }
 0x2e5   :  { %960 = vmatpush.bf16.xpose.msrb.mxu1 %v943_v4 }
 0x2ed   :  { %961 = vmatpush.bf16.xpose.msrb.mxu1 %v942_v58 }
 0x2f5   :  { %962 = vmatpush.bf16.xpose.msrb.mxu1 %v941_v51 }
 0x2fd   :  { %963 = vmatpush.bf16.xpose.msrb.mxu1 %v940_v44 }
 0x304   :  { %964 = vmatmul.bf16.vlgmr.msrb.gmra.mxu1 %v948_v36 }
 0x381   :  { %v965_v37 = vpop.f32.mrf.mxu1 }
 0x382   :  { %v966_v38 = vadd.f32 %v965_v37, %v955_v61 }
 0x384   :  { %969 = vst [vmem:[#allocation3] sm:$0x1] %v966_v38 }
 0x385   :  { %980 = dma.vmem_to_hbm [thread:$0]  %s976_s3, 16, %s978_s11, [#allocation4]  }
 0x389   :  { %v967_v39 = vpop.f32.mrf.mxu1 }
 0x38a   :  { %1234 = dma.done.wait [#allocation4], 16  }
 0x38b   :  { %1235 = vsyncadd [#allocation4], 4294967280 }
 0x38c   :  { %985 = vsyncpa [#allocation4], 1 }

// kernel: tpu_custom_call.1
= control target key start
LH: loop header
LB: loop body
LE: loop exit
PB: predicated region body
PF: predicated region fallthrough
CT: control target
= control target key end

     0   :  { %s1647_s0 = inlined_call_operand.vmem [shape: s32[128,3], index: 0, kind: input, shape index: {}]   ;;  %s1648_s1 = inlined_call_operand.vmem [shape: f32[128,4], index: 1, kind: input, shape index: {}]   ;;  %s1649_s2 = inlined_call_operand.vmem [shape: bf16[128,128], index: 2, kind: input, shape index: {}]   ;;  %s1650_s3 = inlined_call_operand.vmem [shape: bf16[128,128], index: 3, kind: input, shape index: {}]   ;;  %s1651_s4 = inlined_call_operand.vmem [shape: bf16[4,128], index: 4, kind: input, shape index: {}]   ;;  %s1652_s5 = inlined_call_operand.vmem [shape: bf16[128,128], index: 5, kind: input, shape index: {}]   ;;  %s1653_s6 = inlined_call_operand.vmem [shape: f32[2,128], index: 6, kind: input, shape index: {}]   ;;  %s1654_s7 = inlined_call_operand.vmem [shape: bf16[1,128], index: 7, kind: input, shape index: {}]   ;;  %s1655_s8 = inlined_call_operand.<no memory space> [shape: f32[1,1], index: 8, kind: input, shape index: {}]   ;;  %s1656_s9 = inlined_call_operand.hbm [shape: f32[1,128], index: 9, kind: output, shape index: {}]  }
   0x1   :  { %v14_v0 = vstv %s1655_s8 }
   0x2   :  { %15 = vst [vmem:[#allocation2] sm:$0x1] %v14_v0 }
   0x3   :  { %v36_v1 = vld [vmem:[%s1647_s0] sm:$0xff]  ;;  %v1236_v2 = vmov 0   ;;  %v1237_v3 = vmov 1   ;;  %v1238_v6 = vmov 2  }
   0x4   :  { %1167 = vset.pattern.permute.xlu0 %v1236_v2  ;;  %1168 = vset.pattern.permute.xlu1 %v1237_v3  ;;  %v166_v4 = vadd.s32 5, %v36_v1  ;;  %v294_v5 = vadd.s32 12, %v36_v1 }
   0x5   :  { %55 = vperm.xlu0 %1167, %v36_v1   ;;  %1169 = vset.pattern.permute.xlu2 %v1238_v6 }
   0x6   :  { %183 = vperm.xlu1 %1168, %v166_v4   ;;  %311 = vperm.xlu2 %1169, %v294_v5  }
   0x7   :  { %16 = vsyncpa [#allocation4], 0  ;;  %v37_v7 = vld [vmem:[%s1647_s0 + $0x8] sm:$0xff]  ;;  %v38_v10 = vld [vmem:[%s1647_s0 + $0x10] sm:$0xff]  ;;  %v52_v56 = vlaneseq  ;;  %v1239_v61 = vmov 0.0   ;;  %s1240_s29 = smov [#allocation3]  }
   0x8   :  { %v167_v8 = vadd.s32 5, %v37_v7  ;;  %v295_v9 = vadd.s32 12, %v37_v7  ;;  %v168_v11 = vadd.s32 5, %v38_v10  ;;  %v39_v12 = vld [vmem:[%s1647_s0 + $0x18] sm:$0xff]  ;;  %v296_v14 = vadd.s32 12, %v38_v10  ;;  %v40_v16 = vld [vmem:[%s1647_s0 + $0x20] sm:$0xff] }
   0x9   :  { %v169_v13 = vadd.s32 5, %v39_v12  ;;  %v297_v15 = vadd.s32 12, %v39_v12  ;;  %v170_v17 = vadd.s32 5, %v40_v16  ;;  %v41_v18 = vld [vmem:[%s1647_s0 + $0x28] sm:$0xff]  ;;  %v298_v21 = vadd.s32 12, %v40_v16  ;;  %v42_v22 = vld [vmem:[%s1647_s0 + $0x30] sm:$0xff] }
   0xa   :  { %v299_v19 = vadd.s32 12, %v41_v18  ;;  %v171_v20 = vadd.s32 5, %v41_v18  ;;  %v300_v23 = vadd.s32 12, %v42_v22  ;;  %v43_v24 = vld [vmem:[%s1647_s0 + $0x38] sm:$0xff]  ;;  %v45_v25 = vld [vmem:[%s1647_s0 + $0x48] sm:$0xff]  ;;  %v172_v26 = vadd.s32 5, %v42_v22 }
   0xb   :  { %v173_v27 = vadd.s32 5, %v43_v24  ;;  %v46_v28 = vld [vmem:[%s1647_s0 + $0x50] sm:$0xff]  ;;  %v1145_v29 = vld [vmem:[%s1649_s2 + $0x38] sm:$0xff]  ;;  %v301_v30 = vadd.s32 12, %v43_v24  ;;  %v44_v33 = vld [vmem:[%s1647_s0 + $0x40] sm:$0xff]  ;;  %v175_v37 = vadd.s32 5, %v45_v25 }
   0xc   :  { %v47_v31 = vld [vmem:[%s1647_s0 + $0x58] sm:$0xff]  ;;  %494 = vmatpush.bf16.msra.mxu0 %v1145_v29  ;;  %v1144_v32 = vld [vmem:[%s1649_s2 + $0x30] sm:$0xff]  ;;  %v1143_v35 = vld [vmem:[%s1649_s2 + $0x28] sm:$0xff]  ;;  %v174_v36 = vadd.s32 5, %v44_v33  ;;  %v302_v42 = vadd.s32 12, %v44_v33  ;;  %v303_v43 = vadd.s32 12, %v45_v25 }
   0xd   :  { %58 = vperm.xlu0 %1167, %v37_v7   ;;  %v177_v34 = vadd.s32 5, %v47_v31  ;;  %v1142_v38 = vld [vmem:[%s1649_s2 + $0x20] sm:$0xff]  ;;  %v1141_v40 = vld [vmem:[%s1649_s2 + $0x18] sm:$0xff]  ;;  %v1140_v44 = vld [vmem:[%s1649_s2 + $0x10] sm:$0xff]  ;;  %v176_v48 = vadd.s32 5, %v46_v28  ;;  %v304_v53 = vadd.s32 12, %v46_v28 }
   0xe   :  { %186 = vperm.xlu1 %1168, %v167_v8   ;;  %314 = vperm.xlu2 %1169, %v295_v9   ;;  %v48_v39 = vld [vmem:[%s1647_s0 + $0x60] sm:$0xff]  ;;  %v1139_v45 = vld [vmem:[%s1649_s2 + $0x8] sm:$0xff]  ;;  %v1391_v51 = vld [vmem:[%s1647_s0 + $0x70] sm:$0xff]  ;;  %v305_v54 = vadd.s32 12, %v47_v31  ;;  %v1397_v57 = vand.u32 127, %v52_v56  ;;  %s977_s11 = sshll.u32 %s1656_s9, 4  ;;  %s978_s11 = int_to_ptr.hbm [resolvable:$true] %s977_s11 }
   0xf   :  { %v178_v41 = vadd.s32 5, %v48_v39  ;;  %v49_v46 = vld [vmem:[%s1647_s0 + $0x68] sm:$0xff]  ;;  %v1138_v49 = vld [vmem:[%s1649_s2] sm:$0xff]  ;;  %v308_v52 = vadd.s32 12, %v1391_v51  ;;  %v306_v4 = vadd.s32 12, %v48_v39 }
  0x10   :  { %495 = vmatpush.bf16.msra.mxu0 %v1144_v32  ;;  %v307_v47 = vadd.s32 12, %v49_v46  ;;  %v179_v1 = vadd.s32 5, %v49_v46 }
  0x14   :  { %496 = vmatpush.bf16.msra.mxu0 %v1143_v35 }
  0x15   :  { %61 = vperm.xlu0 %1167, %v38_v10  }
  0x16   :  { %1170 = vset.pattern.permute.xlu1 %v1236_v2  ;;  %1171 = vset.pattern.permute.xlu2 %v1237_v3 }
  0x17   :  { %64 = vperm.xlu1 %1170, %v39_v12   ;;  %189 = vperm.xlu2 %1171, %v168_v11  }
  0x18   :  { %497 = vmatpush.bf16.msra.mxu0 %v1142_v38 }
  0x1c   :  { %498 = vmatpush.bf16.msra.mxu0 %v1141_v40 }
  0x1d   :  { %1172 = vset.pattern.permute.xlu0 %v1237_v3 }
  0x1e   :  { %192 = vperm.xlu0 %1172, %v169_v13  }
  0x1f   :  { %1173 = vset.pattern.permute.xlu1 %v1238_v6  ;;  %1174 = vset.pattern.permute.xlu2 %v1238_v6 }
  0x20   :  { %317 = vperm.xlu1 %1173, %v296_v14   ;;  %320 = vperm.xlu2 %1174, %v297_v15  }
  0x21   :  { %499 = vmatpush.bf16.msra.mxu0 %v1140_v44 }
  0x25   :  { %500 = vmatpush.bf16.msra.mxu0 %v1139_v45 }
  0x26   :  { %195 = vperm.xlu0 %1172, %v170_v17  }
  0x28   :  { %1175 = vset.pattern.permute.xlu1 %v1236_v2  ;;  %1176 = vset.pattern.permute.xlu2 %v1236_v2 }
  0x29   :  { %67 = vperm.xlu1 %1175, %v40_v16   ;;  %70 = vperm.xlu2 %1176, %v41_v18  }
  0x2a   :  { %501 = vmatpush.bf16.msra.mxu0 %v1138_v49 }
  0x2e   :  { %1179 = vset.pattern.permute.xlu0 %v1238_v6 }
  0x2f   :  { %326 = vperm.xlu0 %1179, %v299_v19   ;;  %v51_v19 = vld [vmem:[%s1647_s0 + $0x78] sm:$0xff] }
  0x30   :  { %v309_v38 = vadd.s32 12, %v51_v19 }
  0x31   :  { %1177 = vset.pattern.permute.xlu1 %v1237_v3  ;;  %1178 = vset.pattern.permute.xlu2 %v1238_v6 }
  0x32   :  { %198 = vperm.xlu1 %1177, %v171_v20   ;;  %323 = vperm.xlu2 %1178, %v298_v21  }
  0x37   :  { %329 = vperm.xlu0 %1179, %v300_v23  }
  0x3a   :  { %1180 = vset.pattern.permute.xlu1 %v1236_v2  ;;  %1181 = vset.pattern.permute.xlu2 %v1236_v2 }
  0x3b   :  { %73 = vperm.xlu1 %1180, %v42_v22   ;;  %76 = vperm.xlu2 %1181, %v43_v24  }
  0x3f   :  { %1186 = vset.pattern.permute.xlu0 %v1236_v2 }
  0x40   :  { %82 = vperm.xlu0 %1186, %v45_v25   ;;  %v180_v25 = vadd.s32 5, %v1391_v51 }
  0x43   :  { %1182 = vset.pattern.permute.xlu1 %v1237_v3  ;;  %1183 = vset.pattern.permute.xlu2 %v1237_v3 }
  0x44   :  { %201 = vperm.xlu1 %1182, %v172_v26   ;;  %204 = vperm.xlu2 %1183, %v173_v27   ;;  %v181_v26 = vadd.s32 5, %v51_v19 }
  0x48   :  { %85 = vperm.xlu0 %1186, %v46_v28  }
  0x4c   :  { %1184 = vset.pattern.permute.xlu1 %v1238_v6  ;;  %1185 = vset.pattern.permute.xlu2 %v1236_v2 }
  0x4d   :  { %332 = vperm.xlu1 %1184, %v301_v30   ;;  %79 = vperm.xlu2 %1185, %v44_v33  }
  0x50   :  { %1193 = vset.pattern.permute.xlu0 %v1237_v3 }
  0x51   :  { %216 = vperm.xlu0 %1193, %v177_v34  }
  0x55   :  { %1187 = vset.pattern.permute.xlu1 %v1237_v3  ;;  %1188 = vset.pattern.permute.xlu2 %v1237_v3 }
  0x56   :  { %207 = vperm.xlu1 %1187, %v174_v36   ;;  %210 = vperm.xlu2 %1188, %v175_v37  }
  0x59   :  { %219 = vperm.xlu0 %1193, %v178_v41  }
  0x5e   :  { %1189 = vset.pattern.permute.xlu1 %v1238_v6  ;;  %1190 = vset.pattern.permute.xlu2 %v1238_v6 }
  0x5f   :  { %335 = vperm.xlu1 %1189, %v302_v42   ;;  %338 = vperm.xlu2 %1190, %v303_v43  }
  0x60   :  { %v312_v50 = vpop.permute.xlu2 %311 }
  0x61   :  { %1200 = vset.pattern.permute.xlu0 %v1238_v6  ;;  %vm358_vm2 = vcmp.eq.s32.totalorder %v1397_v57, %v312_v50 }
  0x62   :  { %350 = vperm.xlu0 %1200, %v307_v47   ;;  %v1018_v9 = vsel %vm358_vm2, 1.0, %v1239_v61 }
  0x67   :  { %1191 = vset.pattern.permute.xlu1 %v1236_v2  ;;  %1192 = vset.pattern.permute.xlu2 %v1237_v3 }
  0x68   :  { %88 = vperm.xlu1 %1191, %v47_v31   ;;  %213 = vperm.xlu2 %1192, %v176_v48   ;;  %v315_v55 = vpop.permute.xlu2 %314 }
  0x69   :  { %vm359_vm4 = vcmp.eq.s32.totalorder %v1397_v57, %v315_v55 }
  0x6a   :  { %353 = vperm.xlu0 %1200, %v308_v52   ;;  %v1019_v12 = vsel %vm359_vm4, 1.0, %v1239_v61 }
  0x70   :  { %1194 = vset.pattern.permute.xlu1 %v1238_v6  ;;  %1195 = vset.pattern.permute.xlu2 %v1238_v6 }
  0x71   :  { %341 = vperm.xlu1 %1194, %v304_v53   ;;  %344 = vperm.xlu2 %1195, %v305_v54   ;;  %v190_v60 = vpop.permute.xlu2 %189 }
  0x72   :  { %1207 = vset.pattern.permute.xlu0 %v1236_v2  ;;  %vm232_vm6 = vcmp.eq.s32.totalorder %v1397_v57, %v190_v60 }
  0x73   :  { %v1004_v20 = vsel %vm232_vm6, 1.0, %v1239_v61 }
  0x77   :  { %v56_v58 = vpop.permute.xlu0 %55 }
  0x78   :  { %v184_v59 = vpop.permute.xlu1 %183  ;;  %vm102_vm0 = vcmp.eq.s32.totalorder %v1397_v57, %v56_v58 }
  0x79   :  { %1196 = vset.pattern.permute.xlu1 %v1236_v2  ;;  %1197 = vset.pattern.permute.xlu2 %v1236_v2  ;;  %vm230_vm1 = vcmp.eq.s32.totalorder %v1397_v57, %v184_v59  ;;  %v986_v62 = vsel %vm102_vm0, 1.0, %v1239_v61 }
  0x7a   :  { %91 = vperm.xlu1 %1196, %v48_v39   ;;  %94 = vperm.xlu2 %1197, %v49_v46   ;;  %v1002_v63 = vsel %vm230_vm1, 1.0, %v1239_v61  ;;  %v321_v15 = vpop.permute.xlu2 %320 }
  0x7b   :  { %v278_v7 = vadd.f32 %v1002_v63, %v986_v62  ;;  %vm361_vm9 = vcmp.eq.s32.totalorder %v1397_v57, %v321_v15 }
  0x7c   :  { %v1021_v28 = vsel %vm361_vm9, 1.0, %v1239_v61 }
  0x7d   :  { %v406_v13 = vadd.f32 %v1018_v9, %v278_v7 }
  0x7f   :  { %v59_v0 = vpop.permute.xlu0 %58 }
  0x80   :  { %vm103_vm3 = vcmp.eq.s32.totalorder %v1397_v57, %v59_v0  ;;  %v187_v5 = vpop.permute.xlu1 %186 }
  0x81   :  { %v987_v8 = vsel %vm103_vm3, 1.0, %v1239_v61  ;;  %vm231_vm5 = vcmp.eq.s32.totalorder %v1397_v57, %v187_v5 }
  0x82   :  { %v1003_v10 = vsel %vm231_vm5, 1.0, %v1239_v61  ;;  %1198 = vset.pattern.permute.xlu1 %v1237_v3  ;;  %1199 = vset.pattern.permute.xlu2 %v1238_v6 }
  0x83   :  { %v279_v11 = vadd.f32 %v1003_v10, %v987_v8  ;;  %222 = vperm.xlu1 %1198, %v179_v1   ;;  %347 = vperm.xlu2 %1199, %v306_v4   ;;  %v71_v22 = vpop.permute.xlu2 %70 }
  0x84   :  { %vm107_vm14 = vcmp.eq.s32.totalorder %v1397_v57, %v71_v22 }
  0x85   :  { %v407_v14 = vadd.f32 %v1019_v12, %v279_v11 }
  0x87   :  { %v62_v16 = vpop.permute.xlu0 %61  ;;  %v422_v17 = vpack.c.bf16 %v407_v14, %v406_v13 }
  0x88   :  { %vm104_vm7 = vcmp.eq.s32.totalorder %v1397_v57, %v62_v16 }
  0x89   :  { %502 = vmatmul.bf16.vlgmr.msra.gmra.mxu0 %v422_v17  ;;  %v65_v18 = vpop.permute.xlu1 %64  ;;  %v988_v21 = vsel %vm104_vm7, 1.0, %v1239_v61 }
  0x8a   :  { %vm105_vm8 = vcmp.eq.s32.totalorder %v1397_v57, %v65_v18  ;;  %v280_v24 = vadd.f32 %v1004_v20, %v988_v21 }
  0x8b   :  { %1201 = vset.pattern.permute.xlu1 %v1236_v2  ;;  %1202 = vset.pattern.permute.xlu2 %v1236_v2  ;;  %v989_v27 = vsel %vm105_vm8, 1.0, %v1239_v61 }
  0x8c   :  { %97 = vperm.xlu1 %1201, %v1391_v51   ;;  %100 = vperm.xlu2 %1202, %v51_v19   ;;  %v324_v37 = vpop.permute.xlu2 %323  ;;  %v1153_v19 = vld [vmem:[%s1650_s3 + $0x38] sm:$0xff] }
  0x8d   :  { %vm362_vm15 = vcmp.eq.s32.totalorder %v1397_v57, %v324_v37  ;;  %718 = vmatpush.bf16.msra.mxu2 %v1153_v19 }
  0x8e   :  { %v1022_v44 = vsel %vm362_vm15, 1.0, %v1239_v61 }
  0x90   :  { %v193_v23 = vpop.permute.xlu0 %192 }
  0x91   :  { %vm233_vm10 = vcmp.eq.s32.totalorder %v1397_v57, %v193_v23 }
  0x92   :  { %v1005_v29 = vsel %vm233_vm10, 1.0, %v1239_v61  ;;  %v318_v30 = vpop.permute.xlu1 %317 }
  0x93   :  { %v281_v31 = vadd.f32 %v1005_v29, %v989_v27  ;;  %vm360_vm11 = vcmp.eq.s32.totalorder %v1397_v57, %v318_v30  ;;  %v1152_v27 = vld [vmem:[%s1650_s3 + $0x30] sm:$0xff]  ;;  %v1151_v29 = vld [vmem:[%s1650_s3 + $0x28] sm:$0xff] }
  0x94   :  { %v1020_v32 = vsel %vm360_vm11, 1.0, %v1239_v61  ;;  %1203 = vset.pattern.permute.xlu1 %v1237_v3  ;;  %1204 = vset.pattern.permute.xlu2 %v1237_v3 }
  0x95   :  { %v408_v33 = vadd.f32 %v1020_v32, %v280_v24  ;;  %225 = vperm.xlu1 %1203, %v180_v25   ;;  %v409_v34 = vadd.f32 %v1021_v28, %v281_v31  ;;  %228 = vperm.xlu2 %1204, %v181_v26   ;;  %v77_v40 = vpop.permute.xlu2 %76  ;;  %v1150_v32 = vld [vmem:[%s1650_s3 + $0x20] sm:$0xff] }
  0x96   :  { %vm109_vm3 = vcmp.eq.s32.totalorder %v1397_v57, %v77_v40  ;;  %719 = vmatpush.bf16.msra.mxu2 %v1152_v27 }
  0x97   :  { %v423_v35 = vpack.c.bf16 %v409_v34, %v408_v33  ;;  %v993_v58 = vsel %vm109_vm3, 1.0, %v1239_v61 }
  0x98   :  { %v196_v36 = vpop.permute.xlu0 %195 }
  0x99   :  { %507 = vmatmul.bf16.gmra.mxu0 %v423_v35  ;;  %vm234_vm12 = vcmp.eq.s32.totalorder %v1397_v57, %v196_v36  ;;  %v1149_v36 = vld [vmem:[%s1650_s3 + $0x18] sm:$0xff] }
  0x9a   :  { %v1006_v41 = vsel %vm234_vm12, 1.0, %v1239_v61  ;;  %720 = vmatpush.bf16.msra.mxu2 %v1151_v29 }
  0x9b   :  { %v68_v39 = vpop.permute.xlu1 %67 }
  0x9c   :  { %vm106_vm13 = vcmp.eq.s32.totalorder %v1397_v57, %v68_v39 }
  0x9d   :  { %1205 = vset.pattern.permute.xlu1 %v1238_v6  ;;  %1206 = vset.pattern.permute.xlu2 %v1236_v2  ;;  %v990_v42 = vsel %vm106_vm13, 1.0, %v1239_v61  ;;  %v991_v2 = vsel %vm107_vm14, 1.0, %v1239_v61 }
  0x9e   :  { %356 = vperm.xlu1 %1205, %v309_v38   ;;  %v282_v43 = vadd.f32 %v1006_v41, %v990_v42  ;;  %v205_v51 = vpop.permute.xlu2 %204  ;;  %721 = vmatpush.bf16.msra.mxu2 %v1150_v32  ;;  %v1148_v42 = vld [vmem:[%s1650_s3 + $0x10] sm:$0xff] }
  0x9f   :  { %vm237_vm5 = vcmp.eq.s32.totalorder %v1397_v57, %v205_v51 }
  0xa0   :  { %v410_v48 = vadd.f32 %v1022_v44, %v282_v43  ;;  %v1009_v60 = vsel %vm237_vm5, 1.0, %v1239_v61 }
  0xa1   :  { %v327_v3 = vpop.permute.xlu0 %326  ;;  %v285_v4 = vadd.f32 %v1009_v60, %v993_v58  ;;  %v568_v58 = vld [vmem:[%s1648_s1 + $0x8] sm:$0xff] }
  0xa2   :  { %vm363_vm0 = vcmp.eq.s32.totalorder %v1397_v57, %v327_v3  ;;  %722 = vmatpush.bf16.msra.mxu2 %v1149_v36 }
  0xa3   :  { %v1023_v46 = vsel %vm363_vm0, 1.0, %v1239_v61 }
  0xa4   :  { %v199_v6 = vpop.permute.xlu1 %198 }
  0xa5   :  { %vm235_vm1 = vcmp.eq.s32.totalorder %v1397_v57, %v199_v6 }
  0xa6   :  { %v1007_v45 = vsel %vm235_vm1, 1.0, %v1239_v61  ;;  %723 = vmatpush.bf16.msra.mxu2 %v1148_v42  ;;  %v575_v42 = vld [vmem:[%s1648_s1 + $0x40] sm:$0xff] }
  0xa7   :  { %v283_v47 = vadd.f32 %v1007_v45, %v991_v2  ;;  %v80_v53 = vpop.permute.xlu2 %79 }
  0xa8   :  { %vm110_vm12 = vcmp.eq.s32.totalorder %v1397_v57, %v80_v53 }
  0xa9   :  { %v411_v49 = vadd.f32 %v1023_v46, %v283_v47  ;;  %v330_v55 = vpop.permute.xlu0 %329  ;;  %v994_v20 = vsel %vm110_vm12, 1.0, %v1239_v61  ;;  %v1147_v46 = vld [vmem:[%s1650_s3 + $0x8] sm:$0xff] }
  0xaa   :  { %vm364_vm6 = vcmp.eq.s32.totalorder %v1397_v57, %v330_v55  ;;  %724 = vmatpush.bf16.msra.mxu2 %v1147_v46  ;;  %v577_v46 = vld [vmem:[%s1648_s1 + $0x50] sm:$0xff] }
  0xab   :  { %v424_v50 = vpack.c.bf16 %v411_v49, %v410_v48  ;;  %v1024_v63 = vsel %vm364_vm6, 1.0, %v1239_v61  ;;  %v1146_v49 = vld [vmem:[%s1650_s3] sm:$0xff]  ;;  %vm617_vm6 = vcmask 1041408   ;;  %s975_s3 = sshll.u32 %s1240_s29, 4  ;;  %s976_s3 = int_to_ptr.vmem [resolvable:$true] %s975_s3 }
  0xad   :  { %512 = vmatmul.bf16.gmra.mxu0 %v424_v50  ;;  %v74_v52 = vpop.permute.xlu1 %73 }
  0xae   :  { %vm108_vm4 = vcmp.eq.s32.totalorder %v1397_v57, %v74_v52  ;;  %725 = vmatpush.bf16.msra.mxu2 %v1146_v49  ;;  %v591_v52 = vld [vmem:[%s1651_s4] sm:$0x3] }
  0xaf   :  { %v992_v59 = vsel %vm108_vm4, 1.0, %v1239_v61  ;;  %v619_v55 = vsel %vm617_vm6, %v591_v52, 0  ;;  %v1161_v52 = vld [vmem:[%s1652_s5 + $0x38] sm:$0xff] }
  0xb0   :  { %v211_v1 = vpop.permute.xlu2 %210  ;;  %628 = vmatpush.bf16.msra.mxu1 %v619_v55  ;;  %875 = vmatpush.bf16.msra.mxu3 %v1161_v52  ;;  %v580_v55 = vld [vmem:[%s1648_s1 + $0x68] sm:$0xff] }
  0xb1   :  { %vm239_vm8 = vcmp.eq.s32.totalorder %v1397_v57, %v211_v1 }
  0xb2   :  { %v83_v10 = vpop.permute.xlu0 %82  ;;  %v1011_v13 = vsel %vm239_vm8, 1.0, %v1239_v61 }
  0xb3   :  { %vm111_vm9 = vcmp.eq.s32.totalorder %v1397_v57, %v83_v10 }
  0xb4   :  { %v995_v14 = vsel %vm111_vm9, 1.0, %v1239_v61 }
  0xb5   :  { %v287_v15 = vadd.f32 %v1011_v13, %v995_v14  ;;  %v570_v13 = vld [vmem:[%s1648_s1 + $0x18] sm:$0xff] }
  0xb6   :  { %v202_v54 = vpop.permute.xlu1 %201 }
  0xb7   :  { %vm236_vm2 = vcmp.eq.s32.totalorder %v1397_v57, %v202_v54 }
  0xb8   :  { %v1008_v56 = vsel %vm236_vm2, 1.0, %v1239_v61 }
  0xb9   :  { %v284_v62 = vadd.f32 %v1008_v56, %v992_v59  ;;  %v339_v12 = vpop.permute.xlu2 %338  ;;  %v567_v56 = vld [vmem:[%s1648_s1] sm:$0xff] }
  0xba   :  { %vm367_vm11 = vcmp.eq.s32.totalorder %v1397_v57, %v339_v12  ;;  %v86_v18 = vpop.permute.xlu0 %85  ;;  %v583_v60 = vpack.c.bf16 %v568_v58, %v567_v56  ;;  %v569_v12 = vld [vmem:[%s1648_s1 + $0x10] sm:$0xff] }
  0xbb   :  { %v412_v7 = vadd.f32 %v1024_v63, %v284_v62  ;;  %v1027_v17 = vsel %vm367_vm11, 1.0, %v1239_v61  ;;  %vm112_vm0 = vcmp.eq.s32.totalorder %v1397_v57, %v86_v18  ;;  %vm592_vm11 = vcmask 31744  }
  0xbc   :  { %v415_v23 = vadd.f32 %v1027_v17, %v287_v15  ;;  %v996_v37 = vsel %vm112_vm0, 1.0, %v1239_v61  ;;  %1066 = vmatmul.msk.bf16.vlgmr.msra.gmra.mxu1 %vm592_vm11, %v583_v60  ;;  %v584_v14 = vpack.c.bf16 %v570_v13, %v569_v12  ;;  %v1158_v60 = vld [vmem:[%s1652_s5 + $0x20] sm:$0xff] }
  0xbf   :  { %v333_v0 = vpop.permute.xlu1 %332 }
  0xc0   :  { %vm365_vm7 = vcmp.eq.s32.totalorder %v1397_v57, %v333_v0 }
  0xc1   :  { %v1025_v5 = vsel %vm365_vm7, 1.0, %v1239_v61 }
  0xc2   :  { %v413_v8 = vadd.f32 %v1025_v5, %v285_v4  ;;  %v214_v25 = vpop.permute.xlu2 %213 }
  0xc3   :  { %v217_v30 = vpop.permute.xlu0 %216  ;;  %vm240_vm1 = vcmp.eq.s32.totalorder %v1397_v57, %v214_v25 }
  0xc4   :  { %v425_v9 = vpack.c.bf16 %v413_v8, %v412_v7  ;;  %vm241_vm14 = vcmp.eq.s32.totalorder %v1397_v57, %v217_v30  ;;  %v1012_v38 = vsel %vm240_vm1, 1.0, %v1239_v61 }
  0xc5   :  { %v1013_v34 = vsel %vm241_vm14, 1.0, %v1239_v61  ;;  %v288_v41 = vadd.f32 %v1012_v38, %v996_v37  ;;  %v573_v38 = vld [vmem:[%s1648_s1 + $0x30] sm:$0xff] }
  0xc6   :  { %517 = vmatmul.bf16.gmra.mxu0 %v425_v9 }
  0xc8   :  { %v208_v11 = vpop.permute.xlu1 %207 }
  0xc9   :  { %vm238_vm10 = vcmp.eq.s32.totalorder %v1397_v57, %v208_v11 }
  0xca   :  { %v1010_v16 = vsel %vm238_vm10, 1.0, %v1239_v61 }
  0xcb   :  { %v286_v22 = vadd.f32 %v1010_v16, %v994_v20  ;;  %v345_v33 = vpop.permute.xlu2 %344  ;;  %v220_v47 = vpop.permute.xlu0 %219 }
  0xcc   :  { %vm369_vm2 = vcmp.eq.s32.totalorder %v1397_v57, %v345_v33  ;;  %vm242_vm4 = vcmp.eq.s32.totalorder %v1397_v57, %v220_v47  ;;  %1067 = vmatmul.msk.bf16.gmra.mxu1 %vm592_vm11, %v584_v14  ;;  %v571_v33 = vld [vmem:[%s1648_s1 + $0x20] sm:$0xff]  ;;  %v578_v47 = vld [vmem:[%s1648_s1 + $0x58] sm:$0xff] }
  0xcd   :  { %v1029_v3 = vsel %vm369_vm2, 1.0, %v1239_v61  ;;  %v1014_v53 = vsel %vm242_vm4, 1.0, %v1239_v61 }
  0xd1   :  { %v336_v21 = vpop.permute.xlu1 %335 }
  0xd2   :  { %vm366_vm13 = vcmp.eq.s32.totalorder %v1397_v57, %v336_v21 }
  0xd3   :  { %v1026_v24 = vsel %vm366_vm13, 1.0, %v1239_v61 }
  0xd4   :  { %v414_v26 = vadd.f32 %v1026_v24, %v286_v22  ;;  %v95_v44 = vpop.permute.xlu2 %94  ;;  %v351_v51 = vpop.permute.xlu0 %350 }
  0xd5   :  { %vm115_vm7 = vcmp.eq.s32.totalorder %v1397_v57, %v95_v44  ;;  %vm371_vm9 = vcmp.eq.s32.totalorder %v1397_v57, %v351_v51 }
  0xd6   :  { %v426_v28 = vpack.c.bf16 %v415_v23, %v414_v26  ;;  %v999_v63 = vsel %vm115_vm7, 1.0, %v1239_v61  ;;  %v1031_v4 = vsel %vm371_vm9, 1.0, %v1239_v61 }
  0xd8   :  { %522 = vmatmul.bf16.gmra.mxu0 %v426_v28 }
  0xda   :  { %v89_v31 = vpop.permute.xlu1 %88 }
  0xdb   :  { %vm113_vm15 = vcmp.eq.s32.totalorder %v1397_v57, %v89_v31 }
  0xdc   :  { %v997_v35 = vsel %vm113_vm15, 1.0, %v1239_v61  ;;  %v354_v18 = vpop.permute.xlu0 %353 }
  0xdd   :  { %v289_v39 = vadd.f32 %v1013_v34, %v997_v35  ;;  %v348_v50 = vpop.permute.xlu2 %347  ;;  %vm372_vm0 = vcmp.eq.s32.totalorder %v1397_v57, %v354_v18  ;;  %v572_v34 = vld [vmem:[%s1648_s1 + $0x28] sm:$0xff]  ;;  %v1620_v18 = vld [vmem:[%s1653_s6] ss:$0 sm:$0xff] }
  0xde   :  { %vm370_vm8 = vcmp.eq.s32.totalorder %v1397_v57, %v348_v50  ;;  %v1032_v28 = vsel %vm372_vm0, 1.0, %v1239_v61  ;;  %v585_v36 = vpack.c.bf16 %v572_v34, %v571_v33 }
  0xdf   :  { %v417_v43 = vadd.f32 %v1029_v3, %v289_v39  ;;  %v1030_v0 = vsel %vm370_vm8, 1.0, %v1239_v61  ;;  %v574_v39 = vld [vmem:[%s1648_s1 + $0x38] sm:$0xff] }
  0xe0   :  { %1068 = vmatmul.msk.bf16.gmra.mxu1 %vm592_vm11, %v585_v36  ;;  %v586_v3 = vpack.c.bf16 %v574_v39, %v573_v38 }
  0xe3   :  { %v342_v40 = vpop.permute.xlu1 %341 }
  0xe4   :  { %vm368_vm3 = vcmp.eq.s32.totalorder %v1397_v57, %v342_v40 }
  0xe5   :  { %v1028_v6 = vsel %vm368_vm3, 1.0, %v1239_v61 }
  0xe6   :  { %v416_v2 = vadd.f32 %v1028_v6, %v288_v41  ;;  %v101_v10 = vpop.permute.xlu2 %100  ;;  %v576_v6 = vld [vmem:[%s1648_s1 + $0x48] sm:$0xff] }
  0xe7   :  { %vm117_vm13 = vcmp.eq.s32.totalorder %v1397_v57, %v101_v10  ;;  %v1154_v10 = vld [vmem:[%s1652_s5] sm:$0xff] }
  0xe8   :  { %v427_v45 = vpack.c.bf16 %v417_v43, %v416_v2  ;;  %v1001_v20 = vsel %vm117_vm13, 1.0, %v1239_v61  ;;  %v587_v43 = vpack.c.bf16 %v576_v6, %v575_v42 }
  0xea   :  { %527 = vmatmul.bf16.gmra.mxu0 %v427_v45 }
  0xec   :  { %v92_v48 = vpop.permute.xlu1 %91 }
  0xed   :  { %vm114_vm5 = vcmp.eq.s32.totalorder %v1397_v57, %v92_v48  ;;  %v588_v48 = vpack.c.bf16 %v578_v47, %v577_v46 }
  0xee   :  { %v998_v54 = vsel %vm114_vm5, 1.0, %v1239_v61 }
  0xef   :  { %v290_v62 = vadd.f32 %v1014_v53, %v998_v54  ;;  %v229_v17 = vpop.permute.xlu2 %228  ;;  %v1160_v53 = vld [vmem:[%s1652_s5 + $0x30] sm:$0xff]  ;;  %v579_v54 = vld [vmem:[%s1648_s1 + $0x60] sm:$0xff] }
  0xf0   :  { %vm245_vm15 = vcmp.eq.s32.totalorder %v1397_v57, %v229_v17  ;;  %1069 = vmatmul.msk.bf16.gmra.mxu1 %vm592_vm11, %v586_v3  ;;  %v589_v58 = vpack.c.bf16 %v580_v55, %v579_v54  ;;  %876 = vmatpush.bf16.msra.mxu3 %v1160_v53 }
  0xf1   :  { %v418_v7 = vadd.f32 %v1030_v0, %v290_v62  ;;  %v1017_v22 = vsel %vm245_vm15, 1.0, %v1239_v61  ;;  %v1157_v0 = vld [vmem:[%s1652_s5 + $0x18] sm:$0xff] }
  0xf2   :  { %v293_v27 = vadd.f32 %v1017_v22, %v1001_v20 }
  0xf5   :  { %v223_v59 = vpop.permute.xlu1 %222 }
  0xf6   :  { %vm243_vm10 = vcmp.eq.s32.totalorder %v1397_v57, %v223_v59  ;;  %v1159_v59 = vld [vmem:[%s1652_s5 + $0x28] sm:$0xff] }
  0xf7   :  { %v1015_v1 = vsel %vm243_vm10, 1.0, %v1239_v61  ;;  %877 = vmatpush.bf16.msra.mxu3 %v1159_v59 }
  0xf8   :  { %v291_v5 = vadd.f32 %v1015_v1, %v999_v63  ;;  %v1156_v1 = vld [vmem:[%s1652_s5 + $0x10] sm:$0xff] }
  0xfa   :  { %v419_v8 = vadd.f32 %v1031_v4, %v291_v5  ;;  %v581_v4 = vld [vmem:[%s1648_s1 + $0x70] sm:$0xff]  ;;  %v582_v5 = vld [vmem:[%s1648_s1 + $0x78] sm:$0xff] }
  0xfb   :  { %878 = vmatpush.bf16.msra.mxu3 %v1158_v60 }
  0xfc   :  { %v428_v9 = vpack.c.bf16 %v419_v8, %v418_v7  ;;  %v590_v8 = vpack.c.bf16 %v582_v5, %v581_v4 }
  0xfe   :  { %532 = vmatmul.bf16.gmra.mxu0 %v428_v9  ;;  %v98_v11 = vpop.permute.xlu1 %97  ;;  %v1155_v9 = vld [vmem:[%s1652_s5 + $0x8] sm:$0xff] }
  0xff   :  { %vm116_vm14 = vcmp.eq.s32.totalorder %v1397_v57, %v98_v11  ;;  %879 = vmatpush.bf16.msra.mxu3 %v1157_v0 }
 0x100   :  { %v1000_v21 = vsel %vm116_vm14, 1.0, %v1239_v61  ;;  %1070 = vmatmul.msk.bf16.gmra.mxu1 %vm592_vm11, %v587_v43 }
 0x103   :  { %880 = vmatpush.bf16.msra.mxu3 %v1156_v1 }
 0x106   :  { %v503_v15 = vpop.f32.mrf.mxu0 }
 0x107   :  { %v226_v16 = vpop.permute.xlu1 %225  ;;  %881 = vmatpush.bf16.msra.mxu3 %v1155_v9 }
 0x108   :  { %vm244_vm12 = vcmp.eq.s32.totalorder %v1397_v57, %v226_v16 }
 0x109   :  { %v1016_v19 = vsel %vm244_vm12, 1.0, %v1239_v61 }
 0x10a   :  { %v292_v24 = vadd.f32 %v1016_v19, %v1000_v21 }
 0x10b   :  { %882 = vmatpush.bf16.msra.mxu3 %v1154_v10 }
 0x10c   :  { %v420_v31 = vadd.f32 %v1032_v28, %v292_v24 }
 0x10e   :  { %v505_v23 = vpop.f32.mrf.mxu0 }
 0x10f   :  { %v543_v25 = vpack.c.bf16 %v505_v23, %v503_v15 }
 0x110   :  { %v357_v26 = vpop.permute.xlu1 %356  ;;  %1071 = vmatmul.msk.bf16.gmra.mxu1 %vm592_vm11, %v588_v48 }
 0x111   :  { %vm373_vm1 = vcmp.eq.s32.totalorder %v1397_v57, %v357_v26  ;;  %726 = vmatmul.bf16.vlgmr.msra.gmra.mxu2 %v543_v25 }
 0x112   :  { %v1033_v29 = vsel %vm373_vm1, 1.0, %v1239_v61 }
 0x113   :  { %v421_v30 = vadd.f32 %v1033_v29, %v293_v27 }
 0x115   :  { %v429_v32 = vpack.c.bf16 %v421_v30, %v420_v31 }
 0x116   :  { %v508_v35 = vpop.f32.mrf.mxu0 }
 0x117   :  { %537 = vmatmul.bf16.gmra.mxu0 %v429_v32 }
 0x11e   :  { %v510_v57 = vpop.f32.mrf.mxu0 }
 0x11f   :  { %v544_v37 = vpack.c.bf16 %v510_v57, %v508_v35 }
 0x120   :  { %1072 = vmatmul.msk.bf16.gmra.mxu1 %vm592_vm11, %v589_v58 }
 0x121   :  { %731 = vmatmul.bf16.gmra.mxu2 %v544_v37 }
 0x12a   :  { %v513_v61 = vpop.f32.mrf.mxu0 }
 0x130   :  { %1073 = vmatmul.msk.bf16.gmra.mxu1 %vm592_vm11, %v590_v8 }
 0x132   :  { %v515_v40 = vpop.f32.mrf.mxu0 }
 0x133   :  { %v545_v41 = vpack.c.bf16 %v515_v40, %v513_v61 }
 0x135   :  { %736 = vmatmul.bf16.gmra.mxu2 %v545_v41 }
 0x139   :  { %v630_v13 = vpop.f32.mrf.mxu1 }
 0x141   :  { %v632_v16 = vpop.f32.mrf.mxu1 }
 0x143   :  { %v518_v2 = vpop.f32.mrf.mxu0 }
 0x149   :  { %v635_v25 = vpop.f32.mrf.mxu1 }
 0x14b   :  { %v520_v44 = vpop.f32.mrf.mxu0 }
 0x14c   :  { %v546_v45 = vpack.c.bf16 %v520_v44, %v518_v2 }
 0x14e   :  { %741 = vmatmul.bf16.gmra.mxu2 %v546_v45 }
 0x151   :  { %v637_v31 = vpop.f32.mrf.mxu1 }
 0x155   :  { %v523_v49 = vpop.f32.mrf.mxu0 }
 0x15d   :  { %v525_v50 = vpop.f32.mrf.mxu0  ;;  %v640_v61 = vpop.f32.mrf.mxu1 }
 0x15e   :  { %v547_v51 = vpack.c.bf16 %v525_v50, %v523_v49 }
 0x160   :  { %746 = vmatmul.bf16.gmra.mxu2 %v547_v51 }
 0x165   :  { %v642_v3 = vpop.f32.mrf.mxu1 }
 0x167   :  { %v528_v56 = vpop.f32.mrf.mxu0 }
 0x16d   :  { %v645_v45 = vpop.f32.mrf.mxu1 }
 0x16f   :  { %v530_v62 = vpop.f32.mrf.mxu0 }
 0x170   :  { %v548_v63 = vpack.c.bf16 %v530_v62, %v528_v56 }
 0x172   :  { %751 = vmatmul.bf16.gmra.mxu2 %v548_v63 }
 0x175   :  { %v647_v48 = vpop.f32.mrf.mxu1 }
 0x17b   :  { %v533_v7 = vpop.f32.mrf.mxu0 }
 0x17d   :  { %v650_v55 = vpop.f32.mrf.mxu1 }
 0x183   :  { %v535_v11 = vpop.f32.mrf.mxu0 }
 0x184   :  { %v549_v12 = vpack.c.bf16 %v535_v11, %v533_v7 }
 0x185   :  { %v652_v60 = vpop.f32.mrf.mxu1 }
 0x186   :  { %756 = vmatmul.bf16.gmra.mxu2 %v549_v12 }
 0x18d   :  { %v655_v7 = vpop.f32.mrf.mxu1 }
 0x194   :  { %v538_v14 = vpop.f32.mrf.mxu0  ;;  %v727_v15 = vpop.f32.mrf.mxu2 }
 0x195   :  { %v728_v17 = vadd.f32 %v727_v15, %v630_v13  ;;  %v657_v11 = vpop.f32.mrf.mxu1 }
 0x197   :  { %v769_v21 = vadd.f32 %v1620_v18, %v728_v17 }
 0x199   :  { %v785_v26 = vmax.f32 %v769_v21, 0.0 }
 0x19c   :  { %v540_v19 = vpop.f32.mrf.mxu0  ;;  %v729_v20 = vpop.f32.mrf.mxu2 }
 0x19d   :  { %v550_v22 = vpack.c.bf16 %v540_v19, %v538_v14  ;;  %v730_v23 = vadd.f32 %v729_v20, %v632_v16  ;;  %v660_v20 = vpop.f32.mrf.mxu1 }
 0x19f   :  { %v770_v24 = vadd.f32 %v1620_v18, %v730_v23  ;;  %761 = vmatmul.bf16.gmra.mxu2 %v550_v22 }
 0x1a1   :  { %v786_v27 = vmax.f32 %v770_v24, 0.0 }
 0x1a3   :  { %v801_v28 = vpack.c.bf16 %v786_v27, %v785_v26 }
 0x1a4   :  { %v732_v29 = vpop.f32.mrf.mxu2 }
 0x1a5   :  { %883 = vmatmul.bf16.vlgmr.msra.gmra.mxu3 %v801_v28  ;;  %v733_v30 = vadd.f32 %v732_v29, %v635_v25  ;;  %v662_v23 = vpop.f32.mrf.mxu1 }
 0x1a7   :  { %v771_v33 = vadd.f32 %v1620_v18, %v733_v30 }
 0x1a9   :  { %v787_v36 = vmax.f32 %v771_v33, 0.0 }
 0x1ac   :  { %v734_v32 = vpop.f32.mrf.mxu2 }
 0x1ad   :  { %v735_v34 = vadd.f32 %v734_v32, %v637_v31  ;;  %v665_v31 = vpop.f32.mrf.mxu1 }
 0x1af   :  { %v772_v35 = vadd.f32 %v1620_v18, %v735_v34 }
 0x1b1   :  { %v788_v57 = vmax.f32 %v772_v35, 0.0 }
 0x1b3   :  { %v802_v37 = vpack.c.bf16 %v788_v57, %v787_v36 }
 0x1b5   :  { %888 = vmatmul.bf16.gmra.mxu3 %v802_v37  ;;  %v667_v35 = vpop.f32.mrf.mxu1  ;;  %v1209_v37 = vld [vmem:[%s1653_s6 + $0x1] ss:$0 sm:$0xff] }
 0x1b8   :  { %v737_v38 = vpop.f32.mrf.mxu2 }
 0x1b9   :  { %v738_v39 = vadd.f32 %v737_v38, %v640_v61 }
 0x1bb   :  { %v773_v41 = vadd.f32 %v1620_v18, %v738_v39 }
 0x1bd   :  { %v789_v43 = vmax.f32 %v773_v41, 0.0 }
 0x1c0   :  { %v739_v40 = vpop.f32.mrf.mxu2 }
 0x1c1   :  { %v740_v42 = vadd.f32 %v739_v40, %v642_v3 }
 0x1c3   :  { %v774_v6 = vadd.f32 %v1620_v18, %v740_v42 }
 0x1c5   :  { %v790_v2 = vmax.f32 %v774_v6, 0.0 }
 0x1c7   :  { %v803_v44 = vpack.c.bf16 %v790_v2, %v789_v43 }
 0x1c9   :  { %893 = vmatmul.bf16.gmra.mxu3 %v803_v44 }
 0x1d1   :  { %v742_v46 = vpop.f32.mrf.mxu2 }
 0x1d2   :  { %v743_v47 = vadd.f32 %v742_v46, %v645_v45 }
 0x1d4   :  { %v775_v50 = vadd.f32 %v1620_v18, %v743_v47 }
 0x1d6   :  { %v791_v53 = vmax.f32 %v775_v50, 0.0 }
 0x1d9   :  { %v744_v49 = vpop.f32.mrf.mxu2 }
 0x1da   :  { %v745_v51 = vadd.f32 %v744_v49, %v647_v48 }
 0x1dc   :  { %v776_v52 = vadd.f32 %v1620_v18, %v745_v51 }
 0x1de   :  { %v792_v54 = vmax.f32 %v776_v52, 0.0 }
 0x1e0   :  { %v804_v56 = vpack.c.bf16 %v792_v54, %v791_v53 }
 0x1e2   :  { %898 = vmatmul.bf16.gmra.mxu3 %v804_v56 }
 0x1e3   :  { %v747_v58 = vpop.f32.mrf.mxu2 }
 0x1e4   :  { %v748_v59 = vadd.f32 %v747_v58, %v650_v55 }
 0x1e6   :  { %v777_v63 = vadd.f32 %v1620_v18, %v748_v59 }
 0x1e8   :  { %v793_v4 = vmax.f32 %v777_v63, 0.0 }
 0x1eb   :  { %v749_v62 = vpop.f32.mrf.mxu2 }
 0x1ec   :  { %v750_v0 = vadd.f32 %v749_v62, %v652_v60 }
 0x1ee   :  { %v778_v1 = vadd.f32 %v1620_v18, %v750_v0 }
 0x1f0   :  { %v794_v5 = vmax.f32 %v778_v1, 0.0 }
 0x1f2   :  { %v805_v8 = vpack.c.bf16 %v794_v5, %v793_v4 }
 0x1f4   :  { %903 = vmatmul.bf16.gmra.mxu3 %v805_v8 }
 0x1f5   :  { %v752_v9 = vpop.f32.mrf.mxu2 }
 0x1f6   :  { %v753_v10 = vadd.f32 %v752_v9, %v655_v7 }
 0x1f8   :  { %v779_v13 = vadd.f32 %v1620_v18, %v753_v10 }
 0x1fa   :  { %v795_v16 = vmax.f32 %v779_v13, 0.0 }
 0x1fd   :  { %v754_v12 = vpop.f32.mrf.mxu2 }
 0x1fe   :  { %v755_v14 = vadd.f32 %v754_v12, %v657_v11 }
 0x200   :  { %v780_v15 = vadd.f32 %v1620_v18, %v755_v14 }
 0x202   :  { %v796_v17 = vmax.f32 %v780_v15, 0.0 }
 0x204   :  { %v806_v19 = vpack.c.bf16 %v796_v17, %v795_v16 }
 0x206   :  { %908 = vmatmul.bf16.gmra.mxu3 %v806_v19 }
 0x209   :  { %v757_v21 = vpop.f32.mrf.mxu2 }
 0x20a   :  { %v758_v22 = vadd.f32 %v757_v21, %v660_v20 }
 0x20c   :  { %v781_v25 = vadd.f32 %v1620_v18, %v758_v22 }
 0x20e   :  { %v797_v28 = vmax.f32 %v781_v25, 0.0 }
 0x211   :  { %v759_v24 = vpop.f32.mrf.mxu2 }
 0x212   :  { %v760_v26 = vadd.f32 %v759_v24, %v662_v23 }
 0x214   :  { %v782_v27 = vadd.f32 %v1620_v18, %v760_v26 }
 0x216   :  { %v798_v29 = vmax.f32 %v782_v27, 0.0 }
 0x218   :  { %v807_v30 = vpack.c.bf16 %v798_v29, %v797_v28 }
 0x21a   :  { %913 = vmatmul.bf16.gmra.mxu3 %v807_v30 }
 0x222   :  { %v762_v32 = vpop.f32.mrf.mxu2 }
 0x223   :  { %v763_v33 = vadd.f32 %v762_v32, %v665_v31 }
 0x225   :  { %v783_v57 = vadd.f32 %v1620_v18, %v763_v33 }
 0x227   :  { %v799_v39 = vmax.f32 %v783_v57, 0.0 }
 0x228   :  { %v884_v34 = vpop.f32.mrf.mxu3 }
 0x229   :  { %v885_v3 = vadd.f32 %v1209_v37, %v884_v34 }
 0x22a   :  { %v764_v36 = vpop.f32.mrf.mxu2 }
 0x22b   :  { %v765_v61 = vadd.f32 %v764_v36, %v667_v35  ;;  %v924_v43 = vmax.f32 %v885_v3, 0.0  ;;  %v949_v35 = vld [vmem:[#allocation2] sm:$0x1] }
 0x22c   :  { %952 = vperm.xlu2 %1206, %v949_v35   ;;  %v948_v36 = vld [vmem:[%s1654_s7] sm:$0x1] }
 0x22d   :  { %v784_v38 = vadd.f32 %v1620_v18, %v765_v61 }
 0x22f   :  { %v800_v40 = vmax.f32 %v784_v38, 0.0 }
 0x230   :  { %v886_v41 = vpop.f32.mrf.mxu3 }
 0x231   :  { %v887_v42 = vadd.f32 %v1209_v37, %v886_v41  ;;  %v808_v6 = vpack.c.bf16 %v800_v40, %v799_v39 }
 0x233   :  { %v925_v2 = vmax.f32 %v887_v42, 0.0  ;;  %918 = vmatmul.bf16.gmra.mxu3 %v808_v6 }
 0x235   :  { %v940_v44 = vpack.c.bf16 %v925_v2, %v924_v43 }
 0x238   :  { %v889_v45 = vpop.f32.mrf.mxu3 }
 0x239   :  { %v890_v46 = vadd.f32 %v1209_v37, %v889_v45 }
 0x23b   :  { %v926_v49 = vmax.f32 %v890_v46, 0.0 }
 0x240   :  { %v891_v47 = vpop.f32.mrf.mxu3 }
 0x241   :  { %v892_v48 = vadd.f32 %v1209_v37, %v891_v47 }
 0x243   :  { %v927_v50 = vmax.f32 %v892_v48, 0.0 }
 0x245   :  { %v941_v51 = vpack.c.bf16 %v927_v50, %v926_v49 }
 0x24c   :  { %v894_v52 = vpop.f32.mrf.mxu3 }
 0x24d   :  { %v895_v53 = vadd.f32 %v1209_v37, %v894_v52 }
 0x24f   :  { %v928_v55 = vmax.f32 %v895_v53, 0.0 }
 0x254   :  { %v896_v18 = vpop.f32.mrf.mxu3 }
 0x255   :  { %v897_v54 = vadd.f32 %v1209_v37, %v896_v18 }
 0x257   :  { %v929_v56 = vmax.f32 %v897_v54, 0.0 }
 0x259   :  { %v942_v58 = vpack.c.bf16 %v929_v56, %v928_v55 }
 0x265   :  { %v899_v59 = vpop.f32.mrf.mxu3 }
 0x266   :  { %v900_v60 = vadd.f32 %v1209_v37, %v899_v59 }
 0x268   :  { %v930_v0 = vmax.f32 %v900_v60, 0.0 }
 0x26d   :  { %v901_v62 = vpop.f32.mrf.mxu3 }
 0x26e   :  { %v902_v63 = vadd.f32 %v1209_v37, %v901_v62 }
 0x270   :  { %v931_v1 = vmax.f32 %v902_v63, 0.0 }
 0x272   :  { %v943_v4 = vpack.c.bf16 %v931_v1, %v930_v0 }
 0x277   :  { %v904_v5 = vpop.f32.mrf.mxu3 }
 0x278   :  { %v905_v7 = vadd.f32 %v1209_v37, %v904_v5 }
 0x27a   :  { %v932_v10 = vmax.f32 %v905_v7, 0.0 }
 0x27f   :  { %v906_v8 = vpop.f32.mrf.mxu3 }
 0x280   :  { %v907_v9 = vadd.f32 %v1209_v37, %v906_v8 }
 0x282   :  { %v933_v11 = vmax.f32 %v907_v9, 0.0 }
 0x284   :  { %v944_v12 = vpack.c.bf16 %v933_v11, %v932_v10 }
 0x286   :  { %v953_v57 = vpop.permute.xlu2 %952 }
 0x287   :  { %v955_v61 = vperm.slane %v953_v57, 0 }
 0x289   :  { %v909_v13 = vpop.f32.mrf.mxu3 }
 0x28a   :  { %v910_v31 = vadd.f32 %v1209_v37, %v909_v13 }
 0x28c   :  { %v934_v33 = vmax.f32 %v910_v31, 0.0 }
 0x291   :  { %v911_v14 = vpop.f32.mrf.mxu3 }
 0x292   :  { %v912_v29 = vadd.f32 %v1209_v37, %v911_v14 }
 0x294   :  { %v935_v32 = vmax.f32 %v912_v29, 0.0 }
 0x296   :  { %v945_v34 = vpack.c.bf16 %v935_v32, %v934_v33 }
 0x29d   :  { %v914_v15 = vpop.f32.mrf.mxu3 }
 0x29e   :  { %v915_v26 = vadd.f32 %v1209_v37, %v914_v15 }
 0x2a0   :  { %v936_v28 = vmax.f32 %v915_v26, 0.0 }
 0x2a5   :  { %v916_v16 = vpop.f32.mrf.mxu3 }
 0x2a6   :  { %v917_v24 = vadd.f32 %v1209_v37, %v916_v16 }
 0x2a8   :  { %v937_v27 = vmax.f32 %v917_v24, 0.0 }
 0x2aa   :  { %v946_v30 = vpack.c.bf16 %v937_v27, %v936_v28 }
 0x2b6   :  { %v919_v17 = vpop.f32.mrf.mxu3 }
 0x2b7   :  { %v920_v19 = vadd.f32 %v1209_v37, %v919_v17 }
 0x2b9   :  { %v938_v22 = vmax.f32 %v920_v19, 0.0 }
 0x2be   :  { %v921_v20 = vpop.f32.mrf.mxu3 }
 0x2bf   :  { %v922_v21 = vadd.f32 %v1209_v37, %v921_v20 }
 0x2c1   :  { %v939_v23 = vmax.f32 %v922_v21, 0.0 }
 0x2c3   :  { %v947_v25 = vpack.c.bf16 %v939_v23, %v938_v22 }
 0x2c5   :  { %956 = vmatpush.bf16.xpose.msrb.mxu1 %v947_v25 }
 0x2cd   :  { %957 = vmatpush.bf16.xpose.msrb.mxu1 %v946_v30 }
 0x2d5   :  { %958 = vmatpush.bf16.xpose.msrb.mxu1 %v945_v34 }
 0x2dd   :  { %959 = vmatpush.bf16.xpose.msrb.mxu1 %v944_v12 }
 0x2e5   :  { %960 = vmatpush.bf16.xpose.msrb.mxu1 %v943_v4 }
 0x2ed   :  { %961 = vmatpush.bf16.xpose.msrb.mxu1 %v942_v58 }
 0x2f5   :  { %962 = vmatpush.bf16.xpose.msrb.mxu1 %v941_v51 }
 0x2fd   :  { %963 = vmatpush.bf16.xpose.msrb.mxu1 %v940_v44 }
 0x304   :  { %964 = vmatmul.bf16.vlgmr.msrb.gmra.mxu1 %v948_v36 }
 0x381   :  { %v965_v37 = vpop.f32.mrf.mxu1 }
 0x382   :  { %v966_v38 = vadd.f32 %v965_v37, %v955_v61 }
 0x384   :  { %969 = vst [vmem:[#allocation3] sm:$0x1] %v966_v38 }
 0x385   :  { %980 = dma.vmem_to_hbm [thread:$0]  %s976_s3, 16, %s978_s11, [#allocation4]  }
 0x389   :  { %v967_v39 = vpop.f32.mrf.mxu1 }
 0x38a   :  { %1234 = dma.done.wait [#allocation4], 16  }
 0x38b   :  { %1235 = vsyncadd [#allocation4], 4294967280 }
 0x38c   :  { %985 = vsyncpa [#allocation4], 1 }

</bundles_post_ra>
